<compile_context>
chip_gen: v5e
topology: v5e:2x2
jax: 0.10.0
libtpu: 0.0.40
codegen_flags: <defaults>
</compile_context>

<pallas_src>
import functools

import jax
import jax.numpy as jnp
from jax.experimental import pallas as pl
from jax.experimental.pallas import tpu as pltpu

COMPUTE_DTYPE = jnp.bfloat16  # MXU operand dtype (accumulation + epilogue stay f32)


# -----------------------------------------------------------------------------
# Fused conv (+bias, +InstanceNorm, +LeakyReLU) Pallas kernel
# -----------------------------------------------------------------------------
def _conv_fused_kernel(w_ref, p_ref, *out_refs, stages, slope, eps):
    """One grid step == one batch sample.

    w_ref : (Cout, Kp)    weights, bias folded into column K          (bf16)
    p_ref : (1, Kp, HWo)  im2col patches for this sample, row K = 1.0 (bf16)
    out_refs: one (1, Cout, HWo) f32 ref per stage:
              conv(+bias) [, instance-norm] [, leaky-relu]
    Output layout (Cout, HWo) keeps the spatial axis (256/1024) in the lane
    dimension -> lane-dense, unmasked stores (Cout is only 3/4/8).
    """
    acc = jnp.dot(w_ref[...], p_ref[0], preferred_element_type=jnp.float32)
    out_refs[0][0] = acc.astype(out_refs[0].dtype)
    idx = 1
    for st in stages:
        if st == "in":   # InstanceNorm2d(affine=False): per (n, c) over spatial
            mean = jnp.mean(acc, axis=-1, keepdims=True)
            var = jnp.mean(jnp.square(acc - mean), axis=-1, keepdims=True)
            acc = (acc - mean) * jax.lax.rsqrt(var + eps)
        elif st == "lrelu":
            acc = jnp.where(acc >= 0.0, acc, slope * acc)
        out_refs[idx][0] = acc.astype(out_refs[idx].dtype)
        idx += 1


def conv2d_fused(x, w, b, *, stride=1, padding=0, stages=(), slope=0.2, eps=1e-5):
    """Conv2d (NCHW) + fused epilogue as a single pallas_call.

    Returns one NCHW f32 array per stage: (conv_out[, in_out][, lrelu_out]).
    """
    N, Cin, H, W = x.shape
    Cout, _, KH, KW = w.shape
    s, p = stride, padding
    Ho = (H + 2 * p - KH) // s + 1
    Wo = (W + 2 * p - KW) // s + 1
    HWo = Ho * Wo
    K = KH * KW * Cin

    # im2col directly in NCHW: per-sample (K, Ho*Wo), K ordered (kh, kw, cin).
    x_pad = jnp.pad(x, ((0, 0), (0, 0), (p, p), (p, p)))
    cols = []
    for kh in range(KH):
        for kw in range(KW):
            cols.append(x_pad[:, :, kh:kh + s * Ho:s, kw:kw + s * Wo:s])
    patches = jnp.stack(cols, axis=1).reshape(N, K, HWo)

    # Weight (Cout, Cin, KH, KW) -> (Cout, KH, KW, Cin) -> (Cout, K)
    w2 = jnp.transpose(w, (0, 2, 3, 1)).reshape(Cout, K)

    # Pad K to a sublane multiple (8) and fold the bias into the padded region:
    #   patches row K == 1.0, w2 column K == bias  =>  the matmul adds the bias.
    Kp = ((K + 1 + 7) // 8) * 8
    patches = jnp.concatenate(
        [patches,
         jnp.ones((N, 1, HWo), patches.dtype),
         jnp.zeros((N, Kp - K - 1, HWo), patches.dtype)], axis=1)
    w2 = jnp.concatenate(
        [w2, b[:, None], jnp.zeros((Cout, Kp - K - 1), w2.dtype)], axis=1)

    patches = patches.astype(COMPUTE_DTYPE)
    w2 = w2.astype(COMPUTE_DTYPE)

    n_out = 1 + len(stages)
    # Whole-sample blocks (largest ~0.3 MiB) -> no extra tiling even on v7x.
    # grid=(N,) is genuinely parallel over batch samples (megacore on v7x).
    outs = pl.pallas_call(
        functools.partial(_conv_fused_kernel, stages=stages, slope=slope, eps=eps),
        out_shape=tuple(jax.ShapeDtypeStruct((N, Cout, HWo), jnp.float32)
                        for _ in range(n_out)),
        grid=(N,),
        in_specs=[
            pl.BlockSpec((Cout, Kp), lambda n: (0, 0)),
            pl.BlockSpec((1, Kp, HWo), lambda n: (n, 0, 0)),
        ],
        out_specs=tuple(pl.BlockSpec((1, Cout, HWo), lambda n: (n, 0, 0))
                        for _ in range(n_out)),
        compiler_params=pltpu.CompilerParams(dimension_semantics=("parallel",)),
    )(w2, patches)
    return tuple(o.reshape(N, Cout, Ho, Wo) for o in outs)


# -----------------------------------------------------------------------------
# Standalone fallbacks (unreached in this config: 'in'/'lrelu' always follow a
# conv and are fused into its epilogue).  They operate on the natural
# (N, C, H*W) view -- no flatten / relayout glue.
# -----------------------------------------------------------------------------
def _lrelu_kernel(x_ref, o_ref, *, slope):
    x = x_ref[...]
    o_ref[...] = jnp.where(x >= 0, x, slope * x)


def leaky_relu_pallas(x, slope=0.2):
    N, C, H, W = x.shape
    xr = x.reshape(N, C, H * W)
    out = pl.pallas_call(
        functools.partial(_lrelu_kernel, slope=slope),
        out_shape=jax.ShapeDtypeStruct(xr.shape, x.dtype),
        grid=(N,),
        in_specs=[pl.BlockSpec((1, C, H * W), lambda n: (n, 0, 0))],
        out_specs=pl.BlockSpec((1, C, H * W), lambda n: (n, 0, 0)),
        compiler_params=pltpu.CompilerParams(dimension_semantics=("parallel",)),
    )(xr)
    return out.reshape(N, C, H, W)


def _inorm_kernel(x_ref, o_ref, *, eps):
    x = x_ref[...]
    mean = jnp.mean(x, axis=-1, keepdims=True)
    var = jnp.mean(jnp.square(x - mean), axis=-1, keepdims=True)
    o_ref[...] = (x - mean) * jax.lax.rsqrt(var + eps)


def instance_norm_pallas(x, eps=1e-5):
    N, C, H, W = x.shape
    xr = x.reshape(N, C, H * W)
    out = pl.pallas_call(
        functools.partial(_inorm_kernel, eps=eps),
        out_shape=jax.ShapeDtypeStruct(xr.shape, jnp.float32),
        grid=(N,),
        in_specs=[pl.BlockSpec((1, C, H * W), lambda n: (n, 0, 0))],
        out_specs=pl.BlockSpec((1, C, H * W), lambda n: (n, 0, 0)),
        compiler_params=pltpu.CompilerParams(dimension_semantics=("parallel",)),
    )(xr)
    return out.reshape(N, C, H, W)


# -----------------------------------------------------------------------------
# Generator config (stands in for net_info.CONV_NETS) and parameters
# -----------------------------------------------------------------------------
NET_INFO = {
    "CONV_NETS": [
        {   # branch 0: local features + 1x1 global feature
            "layers": [
                {"name": "conv", "in": 3,  "out": 8, "k": 3, "s": 1, "p": 1},  # -> result_list[1] (8,32,32)
                {"name": "lrelu", "slope": 0.2},                               # -> [2]
                {"name": "conv", "in": 8,  "out": 8, "k": 3, "s": 2, "p": 1},  # -> [3] (8,16,16)
                {"name": "in"},                                                # -> [4]
                {"name": "lrelu", "slope": 0.2},                               # -> [5]
                {"name": "conv", "in": 8,  "out": 8, "k": 3, "s": 2, "p": 1},  # -> [6] (8,8,8)
                {"name": "lrelu", "slope": 0.2},                               # -> [7]
                {"name": "conv", "in": 8,  "out": 8, "k": 8, "s": 1, "p": 0},  # -> [8] (8,1,1) global
            ]
        },
        {   # branch 1: fusion / decoder
            "input_index": 2,
            "layers": [
                {"name": "g_concat", "index": 8},                              # -> [9]  (16,32,32)
                {"name": "conv", "in": 16, "out": 8, "k": 3, "s": 1, "p": 1},  # -> [10]
                {"name": "lrelu", "slope": 0.2},                               # -> [11]
                {"name": "res_layer", "index": 2},                             # -> [12]
                {"name": "conv", "in": 8,  "out": 4, "k": 3, "s": 2, "p": 1},  # -> [13] (4,16,16)
                {"name": "lrelu", "slope": 0.2},                               # -> [14]
                {"name": "resize", "scale": 2},                                # -> [15] (4,32,32)
                {"name": "concat", "index": 2},                                # -> [16] (12,32,32)
                {"name": "conv", "in": 12, "out": 3, "k": 3, "s": 1, "p": 1},  # -> [17] (3,32,32)
            ]
        },
    ]
}

GENERATOR_SCALE = 1.0026538655307724  # self.scale; only used by the (unreached) nn.ELU branch


def init_params(net_info, key):
    """Deterministic init mimicking init_weights_netG: N(0, 0.02) weights, zero bias."""
    params = []
    for net_dict in net_info["CONV_NETS"]:
        for layer in net_dict["layers"]:
            if layer["name"] == "conv":
                key, wk = jax.random.split(key)
                w = 0.02 * jax.random.normal(
                    wk, (layer["out"], layer["in"], layer["k"], layer["k"]), jnp.float32)
                b = jnp.zeros((layer["out"],), jnp.float32)
                params.append({"w": w, "b": b})
            else:
                params.append(None)
    return params


# -----------------------------------------------------------------------------
# Forward pass (mirrors Generator.forward)
# -----------------------------------------------------------------------------
def generator_forward(params, net_info, input_dict):
    x = input_dict["img"]
    retouched = input_dict["retouched"]  # noqa: F841  (only used by the fc-list branch)
    # TODO(synk): the 'fc'/'retouched' list branch (exe_fc_layer) and the
    # nn.ELU*scale branch depend on undefined exe_* helpers and are unreachable
    # in this config.

    result_list = [x]
    layers = [l for nd in net_info["CONV_NETS"] for l in nd["layers"]]

    i = 0
    while i < len(layers):
        layer = layers[i]
        name = layer["name"]
        if name == "conv":
            # Fuse an immediately following 'in' and/or 'lrelu' into the conv
            # epilogue (one pallas_call); every intermediate stage is emitted
            # so result_list matches the PyTorch module entry-for-entry.
            stages, slope, j = [], 0.2, i + 1
            if j < len(layers) and layers[j]["name"] == "in":
                stages.append("in"); j += 1
            if j < len(layers) and layers[j]["name"] == "lrelu":
                stages.append("lrelu"); slope = layers[j]["slope"]; j += 1
            p = params[i]
            outs = conv2d_fused(x, p["w"], p["b"], stride=layer["s"],
                                padding=layer["p"], stages=tuple(stages), slope=slope)
            result_list.extend(outs)
            x = outs[-1]
            i = j
            continue

        if name == "lrelu":                  # only reached if not conv-fused
            x = leaky_relu_pallas(x, slope=layer["slope"])
        elif name == "in":                   # only reached if not conv-fused
            x = instance_norm_pallas(x)
        elif name == "g_concat":
            global_feature = result_list[layer["index"]]                 # (N, C, 1, 1)
            global_feature = jnp.tile(global_feature, (1, 1, 32, 32))    # torch .repeat(1,1,32,32)
            x = result_list[net_info["CONV_NETS"][1]["input_index"]]
            x = jnp.concatenate([x, global_feature], axis=1)
        elif name == "concat":
            x = jnp.concatenate([x, result_list[layer["index"]]], axis=1)
        elif name == "resize":
            f = layer["scale"]                                           # nn.Upsample (nearest)
            x = jnp.repeat(jnp.repeat(x, f, axis=2), f, axis=3)
        else:  # 'res_layer' / 'reduce_mean': residual add (matches the torch else-branch)
            x = x + result_list[layer["index"]]
        result_list.append(x)
        i += 1

    return x, result_list


# -----------------------------------------------------------------------------
# Main
# -----------------------------------------------------------------------------
if __name__ == "__main__":
    key = jax.random.PRNGKey(0)
    key, img_key = jax.random.split(key)
    # spatial size 32 is required by the hardcoded repeat(1,1,32,32) in g_concat
    img = jax.random.normal(img_key, (2, 3, 32, 32), jnp.float32)
    params = init_params(NET_INFO, key)

    @jax.jit
    def fwd(params, img):
        return generator_forward(params, NET_INFO, {"img": img, "retouched": False})

    out, result_list = fwd(params, img)
    out, result_list = jax.block_until_ready((out, result_list))

    assert out.shape == (2, 3, 32, 32), out.shape
    assert len(result_list) == 1 + sum(len(nd["layers"]) for nd in NET_INFO["CONV_NETS"])
    assert all(bool(jnp.all(jnp.isfinite(r))) for r in result_list)
    print("KERNEL_OK")
</pallas_src>

<mosaic_0001>
module attributes {stable_mosaic.version = 11 : i64} {
  func.func @_conv_fused_kernel(%arg0: i32, %arg1: memref<8x32xbf16, #tpu.memory_space<vmem>>, %arg2: memref<1x32x1024xbf16, #tpu.memory_space<vmem>>, %arg3: memref<1x8x1024xf32, #tpu.memory_space<vmem>>, %arg4: memref<1x8x1024xf32, #tpu.memory_space<vmem>>) attributes {dimension_semantics = [#tpu.dimension_semantics<parallel>], iteration_bounds = array<i64: 2>, scalar_prefetch = 0 : i64, scratch_operands = 0 : i64, tpu.core_type = #tpu.core_type<tc>, window_params = [{pipeline_mode = #tpu.pipeline_mode<synchronous>, transform_indices = @transform_0, window_bounds = array<i64: 8, 32>}, {transform_indices = @transform_1, window_bounds = array<i64: 1, 32, 1024>}, {transform_indices = @transform_2, window_bounds = array<i64: 1, 8, 1024>}, {transform_indices = @transform_3, window_bounds = array<i64: 1, 8, 1024>}]} {
    %c0 = arith.constant 0 : index
    %c0_0 = arith.constant 0 : index
    %0 = vector.load %arg1[%c0, %c0_0] : memref<8x32xbf16, #tpu.memory_space<vmem>>, vector<8x32xbf16>
    %c0_1 = arith.constant 0 : index
    %c0_2 = arith.constant 0 : index
    %c0_3 = arith.constant 0 : index
    %1 = vector.load %arg2[%c0_1, %c0_2, %c0_3] : memref<1x32x1024xbf16, #tpu.memory_space<vmem>>, vector<1x32x1024xbf16>
    %2 = vector.shape_cast %1 : vector<1x32x1024xbf16> to vector<32x1024xbf16>
    %cst = arith.constant dense<0.000000e+00> : vector<8x1024xf32>
    %3 = tpu.matmul %0, %2, %cst {dimension_numbers = #tpu.dot_dimension_numbers<[1], [0], [0], [1], [0, 0, 1, 1], [], []>} : vector<8x32xbf16>, vector<32x1024xbf16>, vector<8x1024xf32> -> vector<8x1024xf32>
    %c0_4 = arith.constant 0 : index
    %c0_5 = arith.constant 0 : index
    %c0_6 = arith.constant 0 : index
    %4 = vector.load %arg3[%c0_4, %c0_5, %c0_6] : memref<1x8x1024xf32, #tpu.memory_space<vmem>>, vector<1x8x1024xf32>
    %5 = vector.shape_cast %4 : vector<1x8x1024xf32> to vector<8x1024xf32>
    %6 = vector.shape_cast %3 : vector<8x1024xf32> to vector<1x8x1024xf32>
    tpu.vector_store %arg3[%c0_4, %c0_5, %c0_6], %6 {strides = array<i32>} : memref<1x8x1024xf32, #tpu.memory_space<vmem>>, vector<1x8x1024xf32>,
    %cst_7 = arith.constant 0.000000e+00 : f32
    %7 = vector.broadcast %cst_7 : f32 to vector<8x1024xf32>
    %8 = arith.cmpf oge, %3, %7 : vector<8x1024xf32>
    %cst_8 = arith.constant 2.000000e-01 : f32
    %9 = vector.broadcast %cst_8 : f32 to vector<8x1024xf32>
    %10 = arith.mulf %9, %3 : vector<8x1024xf32>
    %11 = arith.select %8, %3, %10 : vector<8x1024xi1>, vector<8x1024xf32>
    %c0_9 = arith.constant 0 : index
    %c0_10 = arith.constant 0 : index
    %c0_11 = arith.constant 0 : index
    %12 = vector.load %arg4[%c0_9, %c0_10, %c0_11] : memref<1x8x1024xf32, #tpu.memory_space<vmem>>, vector<1x8x1024xf32>
    %13 = vector.shape_cast %12 : vector<1x8x1024xf32> to vector<8x1024xf32>
    %14 = vector.shape_cast %11 : vector<8x1024xf32> to vector<1x8x1024xf32>
    tpu.vector_store %arg4[%c0_9, %c0_10, %c0_11], %14 {strides = array<i32>} : memref<1x8x1024xf32, #tpu.memory_space<vmem>>, vector<1x8x1024xf32>,
    return
  }
  func.func @transform_0(%arg0: i32) -> (i32, i32) {
    %c0_i32 = arith.constant 0 : i32
    %c0_i32_0 = arith.constant 0 : i32
    %c0_i32_1 = arith.constant 0 : i32
    return %c0_i32, %c0_i32_0 : i32, i32
  }
  func.func @transform_1(%arg0: i32) -> (i32, i32, i32) {
    %c0_i32 = arith.constant 0 : i32
    %c0_i32_0 = arith.constant 0 : i32
    %c0_i32_1 = arith.constant 0 : i32
    return %arg0, %c0_i32, %c0_i32_0 : i32, i32, i32
  }
  func.func @transform_2(%arg0: i32) -> (i32, i32, i32) {
    %c0_i32 = arith.constant 0 : i32
    %c0_i32_0 = arith.constant 0 : i32
    %c0_i32_1 = arith.constant 0 : i32
    return %arg0, %c0_i32, %c0_i32_0 : i32, i32, i32
  }
  func.func @transform_3(%arg0: i32) -> (i32, i32, i32) {
    %c0_i32 = arith.constant 0 : i32
    %c0_i32_0 = arith.constant 0 : i32
    %c0_i32_1 = arith.constant 0 : i32
    return %arg0, %c0_i32, %c0_i32_0 : i32, i32, i32
  }
}

module attributes {stable_mosaic.version = 11 : i64} {
  func.func @_conv_fused_kernel(%arg0: i32, %arg1: memref<8x80xbf16, #tpu.memory_space<vmem>>, %arg2: memref<1x80x256xbf16, #tpu.memory_space<vmem>>, %arg3: memref<1x8x256xf32, #tpu.memory_space<vmem>>, %arg4: memref<1x8x256xf32, #tpu.memory_space<vmem>>, %arg5: memref<1x8x256xf32, #tpu.memory_space<vmem>>) attributes {dimension_semantics = [#tpu.dimension_semantics<parallel>], iteration_bounds = array<i64: 2>, scalar_prefetch = 0 : i64, scratch_operands = 0 : i64, tpu.core_type = #tpu.core_type<tc>, window_params = [{pipeline_mode = #tpu.pipeline_mode<synchronous>, transform_indices = @transform_0, window_bounds = array<i64: 8, 80>}, {transform_indices = @transform_1, window_bounds = array<i64: 1, 80, 256>}, {transform_indices = @transform_2, window_bounds = array<i64: 1, 8, 256>}, {transform_indices = @transform_3, window_bounds = array<i64: 1, 8, 256>}, {transform_indices = @transform_4, window_bounds = array<i64: 1, 8, 256>}]} {
    %c0 = arith.constant 0 : index
    %c0_0 = arith.constant 0 : index
    %0 = vector.load %arg1[%c0, %c0_0] : memref<8x80xbf16, #tpu.memory_space<vmem>>, vector<8x80xbf16>
    %c0_1 = arith.constant 0 : index
    %c0_2 = arith.constant 0 : index
    %c0_3 = arith.constant 0 : index
    %1 = vector.load %arg2[%c0_1, %c0_2, %c0_3] : memref<1x80x256xbf16, #tpu.memory_space<vmem>>, vector<1x80x256xbf16>
    %2 = vector.shape_cast %1 : vector<1x80x256xbf16> to vector<80x256xbf16>
    %cst = arith.constant dense<0.000000e+00> : vector<8x256xf32>
    %3 = tpu.matmul %0, %2, %cst {dimension_numbers = #tpu.dot_dimension_numbers<[1], [0], [0], [1], [0, 0, 1, 1], [], []>} : vector<8x80xbf16>, vector<80x256xbf16>, vector<8x256xf32> -> vector<8x256xf32>
    %c0_4 = arith.constant 0 : index
    %c0_5 = arith.constant 0 : index
    %c0_6 = arith.constant 0 : index
    %4 = vector.load %arg3[%c0_4, %c0_5, %c0_6] : memref<1x8x256xf32, #tpu.memory_space<vmem>>, vector<1x8x256xf32>
    %5 = vector.shape_cast %4 : vector<1x8x256xf32> to vector<8x256xf32>
    %6 = vector.shape_cast %3 : vector<8x256xf32> to vector<1x8x256xf32>
    tpu.vector_store %arg3[%c0_4, %c0_5, %c0_6], %6 {strides = array<i32>} : memref<1x8x256xf32, #tpu.memory_space<vmem>>, vector<1x8x256xf32>,
    %cst_7 = arith.constant dense<0.000000e+00> : vector<8xf32>
    %7 = vector.multi_reduction <add>, %3, %cst_7 [1] : vector<8x256xf32> to vector<8xf32>
    %8 = vector.shape_cast %7 : vector<8xf32> to vector<8x1xf32>
    %cst_8 = arith.constant 2.560000e+02 : f32
    %9 = vector.broadcast %cst_8 : f32 to vector<8x1xf32>
    %10 = arith.divf %8, %9 : vector<8x1xf32>
    %11 = vector.broadcast %10 : vector<8x1xf32> to vector<8x256xf32>
    %12 = arith.subf %3, %11 : vector<8x256xf32>
    %13 = arith.mulf %12, %12 : vector<8x256xf32>
    %cst_9 = arith.constant dense<0.000000e+00> : vector<8xf32>
    %14 = vector.multi_reduction <add>, %13, %cst_9 [1] : vector<8x256xf32> to vector<8xf32>
    %15 = vector.shape_cast %14 : vector<8xf32> to vector<8x1xf32>
    %cst_10 = arith.constant 2.560000e+02 : f32
    %16 = vector.broadcast %cst_10 : f32 to vector<8x1xf32>
    %17 = arith.divf %15, %16 : vector<8x1xf32>
    %18 = vector.broadcast %10 : vector<8x1xf32> to vector<8x256xf32>
    %19 = arith.subf %3, %18 : vector<8x256xf32>
    %cst_11 = arith.constant 9.99999974E-6 : f32
    %20 = vector.broadcast %cst_11 : f32 to vector<8x1xf32>
    %21 = arith.addf %17, %20 : vector<8x1xf32>
    %22 = math.rsqrt %21 : vector<8x1xf32>
    %23 = vector.broadcast %22 : vector<8x1xf32> to vector<8x256xf32>
    %24 = arith.mulf %19, %23 : vector<8x256xf32>
    %c0_12 = arith.constant 0 : index
    %c0_13 = arith.constant 0 : index
    %c0_14 = arith.constant 0 : index
    %25 = vector.load %arg4[%c0_12, %c0_13, %c0_14] : memref<1x8x256xf32, #tpu.memory_space<vmem>>, vector<1x8x256xf32>
    %26 = vector.shape_cast %25 : vector<1x8x256xf32> to vector<8x256xf32>
    %27 = vector.shape_cast %24 : vector<8x256xf32> to vector<1x8x256xf32>
    tpu.vector_store %arg4[%c0_12, %c0_13, %c0_14], %27 {strides = array<i32>} : memref<1x8x256xf32, #tpu.memory_space<vmem>>, vector<1x8x256xf32>,
    %cst_15 = arith.constant 0.000000e+00 : f32
    %28 = vector.broadcast %cst_15 : f32 to vector<8x256xf32>
    %29 = arith.cmpf oge, %24, %28 : vector<8x256xf32>
    %cst_16 = arith.constant 2.000000e-01 : f32
    %30 = vector.broadcast %cst_16 : f32 to vector<8x256xf32>
    %31 = arith.mulf %30, %24 : vector<8x256xf32>
    %32 = arith.select %29, %24, %31 : vector<8x256xi1>, vector<8x256xf32>
    %c0_17 = arith.constant 0 : index
    %c0_18 = arith.constant 0 : index
    %c0_19 = arith.constant 0 : index
    %33 = vector.load %arg5[%c0_17, %c0_18, %c0_19] : memref<1x8x256xf32, #tpu.memory_space<vmem>>, vector<1x8x256xf32>
    %34 = vector.shape_cast %33 : vector<1x8x256xf32> to vector<8x256xf32>
    %35 = vector.shape_cast %32 : vector<8x256xf32> to vector<1x8x256xf32>
    tpu.vector_store %arg5[%c0_17, %c0_18, %c0_19], %35 {strides = array<i32>} : memref<1x8x256xf32, #tpu.memory_space<vmem>>, vector<1x8x256xf32>,
    return
  }
  func.func @transform_0(%arg0: i32) -> (i32, i32) {
    %c0_i32 = arith.constant 0 : i32
    %c0_i32_0 = arith.constant 0 : i32
    %c0_i32_1 = arith.constant 0 : i32
    return %c0_i32, %c0_i32_0 : i32, i32
  }
  func.func @transform_1(%arg0: i32) -> (i32, i32, i32) {
    %c0_i32 = arith.constant 0 : i32
    %c0_i32_0 = arith.constant 0 : i32
    %c0_i32_1 = arith.constant 0 : i32
    return %arg0, %c0_i32, %c0_i32_0 : i32, i32, i32
  }
  func.func @transform_2(%arg0: i32) -> (i32, i32, i32) {
    %c0_i32 = arith.constant 0 : i32
    %c0_i32_0 = arith.constant 0 : i32
    %c0_i32_1 = arith.constant 0 : i32
    return %arg0, %c0_i32, %c0_i32_0 : i32, i32, i32
  }
  func.func @transform_3(%arg0: i32) -> (i32, i32, i32) {
    %c0_i32 = arith.constant 0 : i32
    %c0_i32_0 = arith.constant 0 : i32
    %c0_i32_1 = arith.constant 0 : i32
    return %arg0, %c0_i32, %c0_i32_0 : i32, i32, i32
  }
  func.func @transform_4(%arg0: i32) -> (i32, i32, i32) {
    %c0_i32 = arith.constant 0 : i32
    %c0_i32_0 = arith.constant 0 : i32
    %c0_i32_1 = arith.constant 0 : i32
    return %arg0, %c0_i32, %c0_i32_0 : i32, i32, i32
  }
}

module attributes {stable_mosaic.version = 11 : i64} {
  func.func @_conv_fused_kernel(%arg0: i32, %arg1: memref<8x80xbf16, #tpu.memory_space<vmem>>, %arg2: memref<1x80x64xbf16, #tpu.memory_space<vmem>>, %arg3: memref<1x8x64xf32, #tpu.memory_space<vmem>>, %arg4: memref<1x8x64xf32, #tpu.memory_space<vmem>>) attributes {dimension_semantics = [#tpu.dimension_semantics<parallel>], iteration_bounds = array<i64: 2>, scalar_prefetch = 0 : i64, scratch_operands = 0 : i64, tpu.core_type = #tpu.core_type<tc>, window_params = [{pipeline_mode = #tpu.pipeline_mode<synchronous>, transform_indices = @transform_0, window_bounds = array<i64: 8, 80>}, {transform_indices = @transform_1, window_bounds = array<i64: 1, 80, 64>}, {transform_indices = @transform_2, window_bounds = array<i64: 1, 8, 64>}, {transform_indices = @transform_3, window_bounds = array<i64: 1, 8, 64>}]} {
    %c0 = arith.constant 0 : index
    %c0_0 = arith.constant 0 : index
    %0 = vector.load %arg1[%c0, %c0_0] : memref<8x80xbf16, #tpu.memory_space<vmem>>, vector<8x80xbf16>
    %c0_1 = arith.constant 0 : index
    %c0_2 = arith.constant 0 : index
    %c0_3 = arith.constant 0 : index
    %1 = vector.load %arg2[%c0_1, %c0_2, %c0_3] : memref<1x80x64xbf16, #tpu.memory_space<vmem>>, vector<1x80x64xbf16>
    %2 = vector.shape_cast %1 : vector<1x80x64xbf16> to vector<80x64xbf16>
    %cst = arith.constant dense<0.000000e+00> : vector<8x64xf32>
    %3 = tpu.matmul %0, %2, %cst {dimension_numbers = #tpu.dot_dimension_numbers<[1], [0], [0], [1], [0, 0, 1, 1], [], []>} : vector<8x80xbf16>, vector<80x64xbf16>, vector<8x64xf32> -> vector<8x64xf32>
    %c0_4 = arith.constant 0 : index
    %c0_5 = arith.constant 0 : index
    %c0_6 = arith.constant 0 : index
    %4 = vector.load %arg3[%c0_4, %c0_5, %c0_6] : memref<1x8x64xf32, #tpu.memory_space<vmem>>, vector<1x8x64xf32>
    %5 = vector.shape_cast %4 : vector<1x8x64xf32> to vector<8x64xf32>
    %6 = vector.shape_cast %3 : vector<8x64xf32> to vector<1x8x64xf32>
    tpu.vector_store %arg3[%c0_4, %c0_5, %c0_6], %6 {strides = array<i32>} : memref<1x8x64xf32, #tpu.memory_space<vmem>>, vector<1x8x64xf32>,
    %cst_7 = arith.constant 0.000000e+00 : f32
    %7 = vector.broadcast %cst_7 : f32 to vector<8x64xf32>
    %8 = arith.cmpf oge, %3, %7 : vector<8x64xf32>
    %cst_8 = arith.constant 2.000000e-01 : f32
    %9 = vector.broadcast %cst_8 : f32 to vector<8x64xf32>
    %10 = arith.mulf %9, %3 : vector<8x64xf32>
    %11 = arith.select %8, %3, %10 : vector<8x64xi1>, vector<8x64xf32>
    %c0_9 = arith.constant 0 : index
    %c0_10 = arith.constant 0 : index
    %c0_11 = arith.constant 0 : index
    %12 = vector.load %arg4[%c0_9, %c0_10, %c0_11] : memref<1x8x64xf32, #tpu.memory_space<vmem>>, vector<1x8x64xf32>
    %13 = vector.shape_cast %12 : vector<1x8x64xf32> to vector<8x64xf32>
    %14 = vector.shape_cast %11 : vector<8x64xf32> to vector<1x8x64xf32>
    tpu.vector_store %arg4[%c0_9, %c0_10, %c0_11], %14 {strides = array<i32>} : memref<1x8x64xf32, #tpu.memory_space<vmem>>, vector<1x8x64xf32>,
    return
  }
  func.func @transform_0(%arg0: i32) -> (i32, i32) {
    %c0_i32 = arith.constant 0 : i32
    %c0_i32_0 = arith.constant 0 : i32
    %c0_i32_1 = arith.constant 0 : i32
    return %c0_i32, %c0_i32_0 : i32, i32
  }
  func.func @transform_1(%arg0: i32) -> (i32, i32, i32) {
    %c0_i32 = arith.constant 0 : i32
    %c0_i32_0 = arith.constant 0 : i32
    %c0_i32_1 = arith.constant 0 : i32
    return %arg0, %c0_i32, %c0_i32_0 : i32, i32, i32
  }
  func.func @transform_2(%arg0: i32) -> (i32, i32, i32) {
    %c0_i32 = arith.constant 0 : i32
    %c0_i32_0 = arith.constant 0 : i32
    %c0_i32_1 = arith.constant 0 : i32
    return %arg0, %c0_i32, %c0_i32_0 : i32, i32, i32
  }
  func.func @transform_3(%arg0: i32) -> (i32, i32, i32) {
    %c0_i32 = arith.constant 0 : i32
    %c0_i32_0 = arith.constant 0 : i32
    %c0_i32_1 = arith.constant 0 : i32
    return %arg0, %c0_i32, %c0_i32_0 : i32, i32, i32
  }
}

module attributes {stable_mosaic.version = 11 : i64} {
  func.func @_conv_fused_kernel(%arg0: i32, %arg1: memref<8x520xbf16, #tpu.memory_space<vmem>>, %arg2: memref<1x520x1xbf16, #tpu.memory_space<vmem>>, %arg3: memref<1x8x1xf32, #tpu.memory_space<vmem>>) attributes {dimension_semantics = [#tpu.dimension_semantics<parallel>], iteration_bounds = array<i64: 2>, scalar_prefetch = 0 : i64, scratch_operands = 0 : i64, tpu.core_type = #tpu.core_type<tc>, window_params = [{pipeline_mode = #tpu.pipeline_mode<synchronous>, transform_indices = @transform_0, window_bounds = array<i64: 8, 520>}, {transform_indices = @transform_1, window_bounds = array<i64: 1, 520, 1>}, {transform_indices = @transform_2, window_bounds = array<i64: 1, 8, 1>}]} {
    %c0 = arith.constant 0 : index
    %c0_0 = arith.constant 0 : index
    %0 = vector.load %arg1[%c0, %c0_0] : memref<8x520xbf16, #tpu.memory_space<vmem>>, vector<8x520xbf16>
    %c0_1 = arith.constant 0 : index
    %c0_2 = arith.constant 0 : index
    %c0_3 = arith.constant 0 : index
    %1 = vector.load %arg2[%c0_1, %c0_2, %c0_3] : memref<1x520x1xbf16, #tpu.memory_space<vmem>>, vector<1x520x1xbf16>
    %2 = vector.shape_cast %1 : vector<1x520x1xbf16> to vector<520x1xbf16>
    %cst = arith.constant dense<0.000000e+00> : vector<8x1xf32>
    %3 = tpu.matmul %0, %2, %cst {dimension_numbers = #tpu.dot_dimension_numbers<[1], [0], [0], [1], [0, 0, 1, 1], [], []>} : vector<8x520xbf16>, vector<520x1xbf16>, vector<8x1xf32> -> vector<8x1xf32>
    %c0_4 = arith.constant 0 : index
    %c0_5 = arith.constant 0 : index
    %c0_6 = arith.constant 0 : index
    %4 = vector.load %arg3[%c0_4, %c0_5, %c0_6] : memref<1x8x1xf32, #tpu.memory_space<vmem>>, vector<1x8x1xf32>
    %5 = vector.shape_cast %4 : vector<1x8x1xf32> to vector<8x1xf32>
    %6 = vector.shape_cast %3 : vector<8x1xf32> to vector<1x8x1xf32>
    tpu.vector_store %arg3[%c0_4, %c0_5, %c0_6], %6 {strides = array<i32>} : memref<1x8x1xf32, #tpu.memory_space<vmem>>, vector<1x8x1xf32>,
    return
  }
  func.func @transform_0(%arg0: i32) -> (i32, i32) {
    %c0_i32 = arith.constant 0 : i32
    %c0_i32_0 = arith.constant 0 : i32
    %c0_i32_1 = arith.constant 0 : i32
    return %c0_i32, %c0_i32_0 : i32, i32
  }
  func.func @transform_1(%arg0: i32) -> (i32, i32, i32) {
    %c0_i32 = arith.constant 0 : i32
    %c0_i32_0 = arith.constant 0 : i32
    %c0_i32_1 = arith.constant 0 : i32
    return %arg0, %c0_i32, %c0_i32_0 : i32, i32, i32
  }
  func.func @transform_2(%arg0: i32) -> (i32, i32, i32) {
    %c0_i32 = arith.constant 0 : i32
    %c0_i32_0 = arith.constant 0 : i32
    %c0_i32_1 = arith.constant 0 : i32
    return %arg0, %c0_i32, %c0_i32_0 : i32, i32, i32
  }
}

module attributes {stable_mosaic.version = 11 : i64} {
  func.func @_conv_fused_kernel(%arg0: i32, %arg1: memref<8x152xbf16, #tpu.memory_space<vmem>>, %arg2: memref<1x152x1024xbf16, #tpu.memory_space<vmem>>, %arg3: memref<1x8x1024xf32, #tpu.memory_space<vmem>>, %arg4: memref<1x8x1024xf32, #tpu.memory_space<vmem>>) attributes {dimension_semantics = [#tpu.dimension_semantics<parallel>], iteration_bounds = array<i64: 2>, scalar_prefetch = 0 : i64, scratch_operands = 0 : i64, tpu.core_type = #tpu.core_type<tc>, window_params = [{pipeline_mode = #tpu.pipeline_mode<synchronous>, transform_indices = @transform_0, window_bounds = array<i64: 8, 152>}, {transform_indices = @transform_1, window_bounds = array<i64: 1, 152, 1024>}, {transform_indices = @transform_2, window_bounds = array<i64: 1, 8, 1024>}, {transform_indices = @transform_3, window_bounds = array<i64: 1, 8, 1024>}]} {
    %c0 = arith.constant 0 : index
    %c0_0 = arith.constant 0 : index
    %0 = vector.load %arg1[%c0, %c0_0] : memref<8x152xbf16, #tpu.memory_space<vmem>>, vector<8x152xbf16>
    %c0_1 = arith.constant 0 : index
    %c0_2 = arith.constant 0 : index
    %c0_3 = arith.constant 0 : index
    %1 = vector.load %arg2[%c0_1, %c0_2, %c0_3] : memref<1x152x1024xbf16, #tpu.memory_space<vmem>>, vector<1x152x1024xbf16>
    %2 = vector.shape_cast %1 : vector<1x152x1024xbf16> to vector<152x1024xbf16>
    %cst = arith.constant dense<0.000000e+00> : vector<8x1024xf32>
    %3 = tpu.matmul %0, %2, %cst {dimension_numbers = #tpu.dot_dimension_numbers<[1], [0], [0], [1], [0, 0, 1, 1], [], []>} : vector<8x152xbf16>, vector<152x1024xbf16>, vector<8x1024xf32> -> vector<8x1024xf32>
    %c0_4 = arith.constant 0 : index
    %c0_5 = arith.constant 0 : index
    %c0_6 = arith.constant 0 : index
    %4 = vector.load %arg3[%c0_4, %c0_5, %c0_6] : memref<1x8x1024xf32, #tpu.memory_space<vmem>>, vector<1x8x1024xf32>
    %5 = vector.shape_cast %4 : vector<1x8x1024xf32> to vector<8x1024xf32>
    %6 = vector.shape_cast %3 : vector<8x1024xf32> to vector<1x8x1024xf32>
    tpu.vector_store %arg3[%c0_4, %c0_5, %c0_6], %6 {strides = array<i32>} : memref<1x8x1024xf32, #tpu.memory_space<vmem>>, vector<1x8x1024xf32>,
    %cst_7 = arith.constant 0.000000e+00 : f32
    %7 = vector.broadcast %cst_7 : f32 to vector<8x1024xf32>
    %8 = arith.cmpf oge, %3, %7 : vector<8x1024xf32>
    %cst_8 = arith.constant 2.000000e-01 : f32
    %9 = vector.broadcast %cst_8 : f32 to vector<8x1024xf32>
    %10 = arith.mulf %9, %3 : vector<8x1024xf32>
    %11 = arith.select %8, %3, %10 : vector<8x1024xi1>, vector<8x1024xf32>
    %c0_9 = arith.constant 0 : index
    %c0_10 = arith.constant 0 : index
    %c0_11 = arith.constant 0 : index
    %12 = vector.load %arg4[%c0_9, %c0_10, %c0_11] : memref<1x8x1024xf32, #tpu.memory_space<vmem>>, vector<1x8x1024xf32>
    %13 = vector.shape_cast %12 : vector<1x8x1024xf32> to vector<8x1024xf32>
    %14 = vector.shape_cast %11 : vector<8x1024xf32> to vector<1x8x1024xf32>
    tpu.vector_store %arg4[%c0_9, %c0_10, %c0_11], %14 {strides = array<i32>} : memref<1x8x1024xf32, #tpu.memory_space<vmem>>, vector<1x8x1024xf32>,
    return
  }
  func.func @transform_0(%arg0: i32) -> (i32, i32) {
    %c0_i32 = arith.constant 0 : i32
    %c0_i32_0 = arith.constant 0 : i32
    %c0_i32_1 = arith.constant 0 : i32
    return %c0_i32, %c0_i32_0 : i32, i32
  }
  func.func @transform_1(%arg0: i32) -> (i32, i32, i32) {
    %c0_i32 = arith.constant 0 : i32
    %c0_i32_0 = arith.constant 0 : i32
    %c0_i32_1 = arith.constant 0 : i32
    return %arg0, %c0_i32, %c0_i32_0 : i32, i32, i32
  }
  func.func @transform_2(%arg0: i32) -> (i32, i32, i32) {
    %c0_i32 = arith.constant 0 : i32
    %c0_i32_0 = arith.constant 0 : i32
    %c0_i32_1 = arith.constant 0 : i32
    return %arg0, %c0_i32, %c0_i32_0 : i32, i32, i32
  }
  func.func @transform_3(%arg0: i32) -> (i32, i32, i32) {
    %c0_i32 = arith.constant 0 : i32
    %c0_i32_0 = arith.constant 0 : i32
    %c0_i32_1 = arith.constant 0 : i32
    return %arg0, %c0_i32, %c0_i32_0 : i32, i32, i32
  }
}

module attributes {stable_mosaic.version = 11 : i64} {
  func.func @_conv_fused_kernel(%arg0: i32, %arg1: memref<4x80xbf16, #tpu.memory_space<vmem>>, %arg2: memref<1x80x256xbf16, #tpu.memory_space<vmem>>, %arg3: memref<1x4x256xf32, #tpu.memory_space<vmem>>, %arg4: memref<1x4x256xf32, #tpu.memory_space<vmem>>) attributes {dimension_semantics = [#tpu.dimension_semantics<parallel>], iteration_bounds = array<i64: 2>, scalar_prefetch = 0 : i64, scratch_operands = 0 : i64, tpu.core_type = #tpu.core_type<tc>, window_params = [{pipeline_mode = #tpu.pipeline_mode<synchronous>, transform_indices = @transform_0, window_bounds = array<i64: 4, 80>}, {transform_indices = @transform_1, window_bounds = array<i64: 1, 80, 256>}, {transform_indices = @transform_2, window_bounds = array<i64: 1, 4, 256>}, {transform_indices = @transform_3, window_bounds = array<i64: 1, 4, 256>}]} {
    %c0 = arith.constant 0 : index
    %c0_0 = arith.constant 0 : index
    %0 = vector.load %arg1[%c0, %c0_0] : memref<4x80xbf16, #tpu.memory_space<vmem>>, vector<4x80xbf16>
    %c0_1 = arith.constant 0 : index
    %c0_2 = arith.constant 0 : index
    %c0_3 = arith.constant 0 : index
    %1 = vector.load %arg2[%c0_1, %c0_2, %c0_3] : memref<1x80x256xbf16, #tpu.memory_space<vmem>>, vector<1x80x256xbf16>
    %2 = vector.shape_cast %1 : vector<1x80x256xbf16> to vector<80x256xbf16>
    %cst = arith.constant dense<0.000000e+00> : vector<4x256xf32>
    %3 = tpu.matmul %0, %2, %cst {dimension_numbers = #tpu.dot_dimension_numbers<[1], [0], [0], [1], [0, 0, 1, 1], [], []>} : vector<4x80xbf16>, vector<80x256xbf16>, vector<4x256xf32> -> vector<4x256xf32>
    %c0_4 = arith.constant 0 : index
    %c0_5 = arith.constant 0 : index
    %c0_6 = arith.constant 0 : index
    %4 = vector.load %arg3[%c0_4, %c0_5, %c0_6] : memref<1x4x256xf32, #tpu.memory_space<vmem>>, vector<1x4x256xf32>
    %5 = vector.shape_cast %4 : vector<1x4x256xf32> to vector<4x256xf32>
    %6 = vector.shape_cast %3 : vector<4x256xf32> to vector<1x4x256xf32>
    tpu.vector_store %arg3[%c0_4, %c0_5, %c0_6], %6 {strides = array<i32>} : memref<1x4x256xf32, #tpu.memory_space<vmem>>, vector<1x4x256xf32>,
    %cst_7 = arith.constant 0.000000e+00 : f32
    %7 = vector.broadcast %cst_7 : f32 to vector<4x256xf32>
    %8 = arith.cmpf oge, %3, %7 : vector<4x256xf32>
    %cst_8 = arith.constant 2.000000e-01 : f32
    %9 = vector.broadcast %cst_8 : f32 to vector<4x256xf32>
    %10 = arith.mulf %9, %3 : vector<4x256xf32>
    %11 = arith.select %8, %3, %10 : vector<4x256xi1>, vector<4x256xf32>
    %c0_9 = arith.constant 0 : index
    %c0_10 = arith.constant 0 : index
    %c0_11 = arith.constant 0 : index
    %12 = vector.load %arg4[%c0_9, %c0_10, %c0_11] : memref<1x4x256xf32, #tpu.memory_space<vmem>>, vector<1x4x256xf32>
    %13 = vector.shape_cast %12 : vector<1x4x256xf32> to vector<4x256xf32>
    %14 = vector.shape_cast %11 : vector<4x256xf32> to vector<1x4x256xf32>
    tpu.vector_store %arg4[%c0_9, %c0_10, %c0_11], %14 {strides = array<i32>} : memref<1x4x256xf32, #tpu.memory_space<vmem>>, vector<1x4x256xf32>,
    return
  }
  func.func @transform_0(%arg0: i32) -> (i32, i32) {
    %c0_i32 = arith.constant 0 : i32
    %c0_i32_0 = arith.constant 0 : i32
    %c0_i32_1 = arith.constant 0 : i32
    return %c0_i32, %c0_i32_0 : i32, i32
  }
  func.func @transform_1(%arg0: i32) -> (i32, i32, i32) {
    %c0_i32 = arith.constant 0 : i32
    %c0_i32_0 = arith.constant 0 : i32
    %c0_i32_1 = arith.constant 0 : i32
    return %arg0, %c0_i32, %c0_i32_0 : i32, i32, i32
  }
  func.func @transform_2(%arg0: i32) -> (i32, i32, i32) {
    %c0_i32 = arith.constant 0 : i32
    %c0_i32_0 = arith.constant 0 : i32
    %c0_i32_1 = arith.constant 0 : i32
    return %arg0, %c0_i32, %c0_i32_0 : i32, i32, i32
  }
  func.func @transform_3(%arg0: i32) -> (i32, i32, i32) {
    %c0_i32 = arith.constant 0 : i32
    %c0_i32_0 = arith.constant 0 : i32
    %c0_i32_1 = arith.constant 0 : i32
    return %arg0, %c0_i32, %c0_i32_0 : i32, i32, i32
  }
}

module attributes {stable_mosaic.version = 11 : i64} {
  func.func @_conv_fused_kernel(%arg0: i32, %arg1: memref<3x112xbf16, #tpu.memory_space<vmem>>, %arg2: memref<1x112x1024xbf16, #tpu.memory_space<vmem>>, %arg3: memref<1x3x1024xf32, #tpu.memory_space<vmem>>) attributes {dimension_semantics = [#tpu.dimension_semantics<parallel>], iteration_bounds = array<i64: 2>, scalar_prefetch = 0 : i64, scratch_operands = 0 : i64, tpu.core_type = #tpu.core_type<tc>, window_params = [{pipeline_mode = #tpu.pipeline_mode<synchronous>, transform_indices = @transform_0, window_bounds = array<i64: 3, 112>}, {transform_indices = @transform_1, window_bounds = array<i64: 1, 112, 1024>}, {transform_indices = @transform_2, window_bounds = array<i64: 1, 3, 1024>}]} {
    %c0 = arith.constant 0 : index
    %c0_0 = arith.constant 0 : index
    %0 = vector.load %arg1[%c0, %c0_0] : memref<3x112xbf16, #tpu.memory_space<vmem>>, vector<3x112xbf16>
    %c0_1 = arith.constant 0 : index
    %c0_2 = arith.constant 0 : index
    %c0_3 = arith.constant 0 : index
    %1 = vector.load %arg2[%c0_1, %c0_2, %c0_3] : memref<1x112x1024xbf16, #tpu.memory_space<vmem>>, vector<1x112x1024xbf16>
    %2 = vector.shape_cast %1 : vector<1x112x1024xbf16> to vector<112x1024xbf16>
    %cst = arith.constant dense<0.000000e+00> : vector<3x1024xf32>
    %3 = tpu.matmul %0, %2, %cst {dimension_numbers = #tpu.dot_dimension_numbers<[1], [0], [0], [1], [0, 0, 1, 1], [], []>} : vector<3x112xbf16>, vector<112x1024xbf16>, vector<3x1024xf32> -> vector<3x1024xf32>
    %c0_4 = arith.constant 0 : index
    %c0_5 = arith.constant 0 : index
    %c0_6 = arith.constant 0 : index
    %4 = vector.load %arg3[%c0_4, %c0_5, %c0_6] : memref<1x3x1024xf32, #tpu.memory_space<vmem>>, vector<1x3x1024xf32>
    %5 = vector.shape_cast %4 : vector<1x3x1024xf32> to vector<3x1024xf32>
    %6 = vector.shape_cast %3 : vector<3x1024xf32> to vector<1x3x1024xf32>
    tpu.vector_store %arg3[%c0_4, %c0_5, %c0_6], %6 {strides = array<i32>} : memref<1x3x1024xf32, #tpu.memory_space<vmem>>, vector<1x3x1024xf32>,
    return
  }
  func.func @transform_0(%arg0: i32) -> (i32, i32) {
    %c0_i32 = arith.constant 0 : i32
    %c0_i32_0 = arith.constant 0 : i32
    %c0_i32_1 = arith.constant 0 : i32
    return %c0_i32, %c0_i32_0 : i32, i32
  }
  func.func @transform_1(%arg0: i32) -> (i32, i32, i32) {
    %c0_i32 = arith.constant 0 : i32
    %c0_i32_0 = arith.constant 0 : i32
    %c0_i32_1 = arith.constant 0 : i32
    return %arg0, %c0_i32, %c0_i32_0 : i32, i32, i32
  }
  func.func @transform_2(%arg0: i32) -> (i32, i32, i32) {
    %c0_i32 = arith.constant 0 : i32
    %c0_i32_0 = arith.constant 0 : i32
    %c0_i32_1 = arith.constant 0 : i32
    return %arg0, %c0_i32, %c0_i32_0 : i32, i32, i32
  }
}

</mosaic_0001>

<bundles_post_ra>
// kernel: fwd.7
= control target key start
LH: loop header
LB: loop body
LE: loop exit
PB: predicated region body
PF: predicated region fallthrough
CT: control target
= control target key end

     0   :  { %s658_s12 = smov 0   ;;  %s747_s0 = inlined_call_operand.vmem [shape: bf16[8,32], index: 0, kind: input, shape index: {}]   ;;  %s748_s1 = inlined_call_operand.vmem [shape: bf16[2,32,1024], index: 1, kind: input, shape index: {}]   ;;  %s749_s2 = inlined_call_operand.vmem [shape: f32[2,8,1024], index: 2, kind: output, shape index: {0}]   ;;  %s750_s3 = inlined_call_operand.vmem [shape: f32[2,8,1024], index: 3, kind: output, shape index: {1}]  }
   0x1 LB: > { %s518_s13 = sadd.s32 4294967295, %s636_s12   ;;  %p522_p0 = scmp.ge.s32.totalorder %s636_s12, 1  ;;  %s636_s12 = sphi %s658_s12, %s14_s12  }
   0x2   : > { %p140_p1 = scmp.lt.s32.totalorder %s636_s12, 3 }
   0x4   : > { %p141_p2 = pnand %p522_p0, %p140_p1 }
   0x5   : > { %p169_p3 = scmp.lt.s32.totalorder (!%p141_p2), %s518_s13, 1 }
   0x6   : > { %144 = sbr.rel (%p141_p2) target bundleno = 183 (0xb7), region = 28 }
   0xb   : > { %s752_s13 = smov (!%p169_p3, %s518_s13), 1  ;;  %vm282_vm0 = vcmask 261120   ;;  %v185_v23 = vld [vmem:[%s747_s0] sm:$0xf] }
   0xc   : > { %s603_s14 = sshll.u32 %s752_s13, 7  ;;  %s604_s20 = sshll.u32 %s752_s13, 6 }
   0xd   : > { %s672_s17 = scalar_lea.vmem %s748_s1, %s603_s14  ;;  %s721_s23 = scalar_lea.vmem %s749_s2, %s604_s20 }
   0xe   : > { %v563_v0 = vld [vmem:[%s672_s17 + $0x40] sm:$0xf]  ;;  %v614_v2 = vld [vmem:[%s672_s17 + $0x44] sm:$0xf]  ;;  %v571_v5 = vld [vmem:[%s672_s17 + $0x48] sm:$0xf]  ;;  %s726_s26 = scalar_lea.vmem %s750_s3, %s604_s20 }
   0xf   : > { %v618_v1 = vld [vmem:[%s672_s17 + $0x5c] sm:$0xf0]  ;;  %v565_v4 = vld [vmem:[%s672_s17 + $0x60] sm:$0xf0]  ;;  %v619_v6 = vld [vmem:[%s672_s17 + $0x64] sm:$0xf0] }
  0x10   : > { %v564_v3 = vor.u32 %v618_v1, %v563_v0  ;;  %v568_v7 = vor.u32 %v614_v2, %v565_v4  ;;  %v572_v8 = vor.u32 %v619_v6, %v571_v5  ;;  %v615_v9 = vld [vmem:[%s672_s17 + $0x4c] sm:$0xf]  ;;  %v531_v11 = vld [vmem:[%s672_s17] sm:$0xf]  ;;  %v606_v14 = vld [vmem:[%s672_s17 + $0x4] sm:$0xf] }
  0x11   : > { %v573_v10 = vld [vmem:[%s672_s17 + $0x68] sm:$0xf0]  ;;  %v610_v13 = vld [vmem:[%s672_s17 + $0x1c] sm:$0xf0]  ;;  %v533_v15 = vld [vmem:[%s672_s17 + $0x20] sm:$0xf0] }
  0x12   : > { %292 = vmatpush.bf16.msra.mxu0 %v564_v3  ;;  %v576_v12 = vor.u32 %v615_v9, %v573_v10  ;;  %305 = vmatpush.bf16.msra.mxu1 %v568_v7  ;;  %v532_v16 = vor.u32 %v610_v13, %v531_v11  ;;  %v536_v17 = vor.u32 %v606_v14, %v533_v15  ;;  %v539_v18 = vld [vmem:[%s672_s17 + $0x8] sm:$0xf]  ;;  %v607_v20 = vld [vmem:[%s672_s17 + $0xc] sm:$0xf]  ;;  %v587_v24 = vld [vmem:[%s672_s17 + $0x58] sm:$0xf] }
  0x13   : > { %318 = vmatpush.bf16.msra.mxu2 %v572_v8  ;;  %v611_v19 = vld [vmem:[%s672_s17 + $0x24] sm:$0xf0]  ;;  %v541_v22 = vld [vmem:[%s672_s17 + $0x28] sm:$0xf0]  ;;  %v621_v25 = vld [vmem:[%s672_s17 + $0x74] sm:$0xf0] }
  0x14   : > { %331 = vmatpush.bf16.msra.mxu3 %v576_v12  ;;  %v540_v21 = vor.u32 %v611_v19, %v539_v18  ;;  %v544_v26 = vor.u32 %v607_v20, %v541_v22  ;;  %v588_v27 = vor.u32 %v621_v25, %v587_v24  ;;  %v617_v28 = vld [vmem:[%s672_s17 + $0x5c] sm:$0xf]  ;;  %v579_v30 = vld [vmem:[%s672_s17 + $0x50] sm:$0xf]  ;;  %v616_v33 = vld [vmem:[%s672_s17 + $0x54] sm:$0xf] }
  0x15   : > { %v589_v29 = vld [vmem:[%s672_s17 + $0x78] sm:$0xf0]  ;;  %v620_v32 = vld [vmem:[%s672_s17 + $0x6c] sm:$0xf0]  ;;  %v581_v34 = vld [vmem:[%s672_s17 + $0x70] sm:$0xf0] }
  0x16   : > { %293 = vmatpush.bf16.msra.mxu0 %v532_v16  ;;  %v592_v31 = vor.u32 %v617_v28, %v589_v29  ;;  %306 = vmatpush.bf16.msra.mxu1 %v536_v17  ;;  %v580_v35 = vor.u32 %v620_v32, %v579_v30  ;;  %v555_v36 = vld [vmem:[%s672_s17 + $0x18] sm:$0xf]  ;;  %v609_v38 = vld [vmem:[%s672_s17 + $0x1c] sm:$0xf]  ;;  %v584_v39 = vor.u32 %v616_v33, %v581_v34  ;;  %v547_v42 = vld [vmem:[%s672_s17 + $0x10] sm:$0xf] }
  0x17   : > { %319 = vmatpush.bf16.msra.mxu2 %v540_v21  ;;  %v613_v37 = vld [vmem:[%s672_s17 + $0x34] sm:$0xf0]  ;;  %v557_v41 = vld [vmem:[%s672_s17 + $0x38] sm:$0xf0]  ;;  %v612_v43 = vld [vmem:[%s672_s17 + $0x2c] sm:$0xf0] }
  0x18   : > { %332 = vmatpush.bf16.msra.mxu3 %v544_v26  ;;  %v556_v40 = vor.u32 %v613_v37, %v555_v36  ;;  %v560_v44 = vor.u32 %v609_v38, %v557_v41  ;;  %v608_v45 = vld [vmem:[%s672_s17 + $0x14] sm:$0xf]  ;;  %v548_v47 = vor.u32 %v612_v43, %v547_v42 }
  0x19   : > { %593 = vmatmul.msk.bf16.vlgmr.msra.gmra.mxu0 %vm282_vm0, %v185_v23  ;;  %v549_v46 = vld [vmem:[%s672_s17 + $0x30] sm:$0xf0]  ;;  %594 = vmatmul.msk.bf16.vlgmr.msra.gmra.mxu1 %vm282_vm0, %v185_v23 }
  0x1a   : > { %595 = vmatmul.msk.bf16.vlgmr.msra.gmra.mxu2 %vm282_vm0, %v185_v23  ;;  %344 = vmatpush.bf16.msrb.mxu0 %v580_v35  ;;  %v552_v48 = vor.u32 %v608_v45, %v549_v46 }
  0x1b   : > { %370 = vmatpush.bf16.msrb.mxu2 %v588_v27  ;;  %596 = vmatmul.msk.bf16.vlgmr.msra.gmra.mxu3 %vm282_vm0, %v185_v23 }
  0x1c   : > { %383 = vmatpush.bf16.msrb.mxu3 %v592_v31  ;;  %357 = vmatpush.bf16.msrb.mxu1 %v584_v39 }
  0x1e   : > { %345 = vmatpush.bf16.msrb.mxu0 %v548_v47 }
  0x1f   : > { %371 = vmatpush.bf16.msrb.mxu2 %v556_v40 }
  0x20   : > { %384 = vmatpush.bf16.msrb.mxu3 %v560_v44  ;;  %358 = vmatpush.bf16.msrb.mxu1 %v552_v48 }
  0x29   : > { %597 = vmatmul.msk.bf16.vlgmr.msrb.gmra.mxu0 %vm282_vm0, %v185_v23  ;;  %598 = vmatmul.msk.bf16.vlgmr.msrb.gmra.mxu1 %vm282_vm0, %v185_v23 }
  0x2a   : > { %599 = vmatmul.msk.bf16.vlgmr.msrb.gmra.mxu2 %vm282_vm0, %v185_v23 }
  0x2b   : > { %600 = vmatmul.msk.bf16.vlgmr.msrb.gmra.mxu3 %vm282_vm0, %v185_v23 }
  0x96   : > { %v295_v49 = vpop.f32.mrf.mxu0  ;;  %v308_v51 = vpop.f32.mrf.mxu1 }
  0x97   : > { %390 = vst [vmem:[%s721_s23] sm:$0xff] %v295_v49  ;;  %vm398_vm1 = vcmp.ge.f32.partialorder %v295_v49, 0.0  ;;  %v406_v50 = vmul.f32 0.2, %v295_v49  ;;  %vm399_vm2 = vcmp.ge.f32.partialorder %v308_v51, 0.0  ;;  %v407_v52 = vmul.f32 0.2, %v308_v51 }
  0x98   : > { %391 = vst [vmem:[%s721_s23 + $0x8] sm:$0xff] %v308_v51 }
  0x99   : > { %v414_v53 = vsel %vm398_vm1, %v295_v49, %v406_v50  ;;  %v415_v54 = vsel %vm399_vm2, %v308_v51, %v407_v52 }
  0x9a   : > { %422 = vst [vmem:[%s726_s26] sm:$0xff] %v414_v53 }
  0x9b   : > { %423 = vst [vmem:[%s726_s26 + $0x8] sm:$0xff] %v415_v54 }
  0x9d   : > { %v321_v55 = vpop.f32.mrf.mxu2 }
  0x9e   : > { %392 = vst [vmem:[%s721_s23 + $0x10] sm:$0xff] %v321_v55  ;;  %vm400_vm3 = vcmp.ge.f32.partialorder %v321_v55, 0.0  ;;  %v408_v56 = vmul.f32 0.2, %v321_v55  ;;  %v334_v57 = vpop.f32.mrf.mxu3  ;;  %v297_v58 = vpop.f32.mrf.mxu0 }
  0x9f   : > { %393 = vst [vmem:[%s721_s23 + $0x18] sm:$0xff] %v334_v57  ;;  %vm401_vm4 = vcmp.ge.f32.partialorder %v334_v57, 0.0  ;;  %v409_v59 = vmul.f32 0.2, %v334_v57  ;;  %v310_v60 = vpop.f32.mrf.mxu1 }
  0xa0   : > { %v416_v61 = vsel %vm400_vm3, %v321_v55, %v408_v56 }
  0xa1   : > { %424 = vst [vmem:[%s726_s26 + $0x10] sm:$0xff] %v416_v61  ;;  %v417_v62 = vsel %vm401_vm4, %v334_v57, %v409_v59 }
  0xa2   : > { %425 = vst [vmem:[%s726_s26 + $0x18] sm:$0xff] %v417_v62 }
  0xa5   : > { %v323_v63 = vpop.f32.mrf.mxu2 }
  0xa6   : > { %v336_v0 = vpop.f32.mrf.mxu3  ;;  %v347_v1 = vpop.f32.mrf.mxu0 }
  0xa7   : > { %394 = vst [vmem:[%s721_s23 + $0x20] sm:$0xff] %v347_v1  ;;  %vm402_vm5 = vcmp.ge.f32.partialorder %v347_v1, 0.0  ;;  %v410_v2 = vmul.f32 0.2, %v347_v1  ;;  %v360_v3 = vpop.f32.mrf.mxu1 }
  0xa8   : > { %395 = vst [vmem:[%s721_s23 + $0x28] sm:$0xff] %v360_v3  ;;  %vm403_vm6 = vcmp.ge.f32.partialorder %v360_v3, 0.0  ;;  %v411_v4 = vmul.f32 0.2, %v360_v3 }
  0xa9   : > { %v418_v5 = vsel %vm402_vm5, %v347_v1, %v410_v2 }
  0xaa   : > { %426 = vst [vmem:[%s726_s26 + $0x20] sm:$0xff] %v418_v5  ;;  %v419_v6 = vsel %vm403_vm6, %v360_v3, %v411_v4 }
  0xab   : > { %427 = vst [vmem:[%s726_s26 + $0x28] sm:$0xff] %v419_v6 }
  0xad   : > { %v373_v7 = vpop.f32.mrf.mxu2 }
  0xae   : > { %396 = vst [vmem:[%s721_s23 + $0x30] sm:$0xff] %v373_v7  ;;  %vm404_vm7 = vcmp.ge.f32.partialorder %v373_v7, 0.0  ;;  %v412_v8 = vmul.f32 0.2, %v373_v7  ;;  %v386_v9 = vpop.f32.mrf.mxu3  ;;  %v349_v10 = vpop.f32.mrf.mxu0 }
  0xaf   : > { %397 = vst [vmem:[%s721_s23 + $0x38] sm:$0xff] %v386_v9  ;;  %vm405_vm8 = vcmp.ge.f32.partialorder %v386_v9, 0.0  ;;  %v413_v11 = vmul.f32 0.2, %v386_v9  ;;  %v362_v12 = vpop.f32.mrf.mxu1 }
  0xb0   : > { %v420_v13 = vsel %vm404_vm7, %v373_v7, %v412_v8 }
  0xb1   : > { %428 = vst [vmem:[%s726_s26 + $0x30] sm:$0xff] %v420_v13  ;;  %v421_v14 = vsel %vm405_vm8, %v386_v9, %v413_v11 }
  0xb2   : > { %429 = vst [vmem:[%s726_s26 + $0x38] sm:$0xff] %v421_v14 }
  0xb5   : > { %v375_v15 = vpop.f32.mrf.mxu2 }
  0xb6   : > { %v388_v16 = vpop.f32.mrf.mxu3 }
  0xb7 PF: > { %s14_s12 = sadd.s32 1, %s636_s12  }
  0xb8   : > { %p11_p4 = scmp.ge.s32.totalorder %s14_s12, 4  }
  0xba   :  { %13 = sbr.rel (!%p11_p4) target bundleno = 1 (0x1), region = 70 }

// kernel: fwd.8
= control target key start
LH: loop header
LB: loop body
LE: loop exit
PB: predicated region body
PF: predicated region fallthrough
CT: control target
= control target key end

     0   :  { %s597_s15 = smov 0   ;;  %s654_s0 = inlined_call_operand.vmem [shape: bf16[8,80], index: 0, kind: input, shape index: {}]   ;;  %s655_s1 = inlined_call_operand.vmem [shape: bf16[2,80,256], index: 1, kind: input, shape index: {}]   ;;  %s656_s2 = inlined_call_operand.vmem [shape: f32[2,8,256], index: 2, kind: output, shape index: {0}]   ;;  %s657_s3 = inlined_call_operand.vmem [shape: f32[2,8,256], index: 3, kind: output, shape index: {1}]   ;;  %s658_s4 = inlined_call_operand.vmem [shape: f32[2,8,256], index: 4, kind: output, shape index: {2}]  }
   0x1 LB: > { %s480_s16 = sadd.s32 4294967295, %s569_s15   ;;  %p484_p0 = scmp.ge.s32.totalorder %s569_s15, 1  ;;  %s569_s15 = sphi %s597_s15, %s15_s15  }
   0x2   : > { %p167_p1 = scmp.lt.s32.totalorder %s569_s15, 3 }
   0x4   : > { %p168_p2 = pnand %p484_p0, %p167_p1 }
   0x5   : > { %p203_p3 = scmp.lt.s32.totalorder (!%p168_p2), %s480_s16, 1 }
   0x6   : > { %171 = sbr.rel (%p168_p2) target bundleno = 435 (0x1b3), region = 28 }
   0xb   : > { %s660_s16 = smov (!%p203_p3, %s480_s16), 1  ;;  %v224_v30 = vld [vmem:[%s654_s0] sm:$0xf]  ;;  %vm285_vm0 = vcmask 654336   ;;  %v571_v36 = vmov 256.0  }
   0xc   : > { %s549_s17 = smul.u32 80, %s660_s16  ;;  %s637_s23 = sshll.u32 %s660_s16, 4  ;;  %559 = vrcp.f32 %v571_v36 }
   0xd   : > { %s212_s26 = scalar_lea.vmem %s656_s2, %s637_s23  ;;  %s217_s29 = scalar_lea.vmem %s657_s3, %s637_s23 }
   0xe   : > { %s611_s20 = scalar_lea.vmem %s655_s1, %s549_s17  ;;  %s222_s6 = scalar_lea.vmem %s658_s4, %s637_s23 }
   0xf   : > { %v526_v0 = vld [vmem:[%s611_s20 + $0x40] sm:$0xf]  ;;  %v548_v1 = vld [vmem:[%s611_s20 + $0x44] sm:$0xf0]  ;;  %v547_v2 = vld [vmem:[%s611_s20 + $0x44] sm:$0xf] }
  0x10   : > { %v527_v3 = vor.u32 %v548_v1, %v526_v0  ;;  %v528_v4 = vld [vmem:[%s611_s20 + $0x48] sm:$0xf0]  ;;  %v518_v5 = vld [vmem:[%s611_s20 + $0x30] sm:$0xf]  ;;  %v546_v6 = vld [vmem:[%s611_s20 + $0x34] sm:$0xf0] }
  0x11   : > { %v531_v7 = vor.u32 %v547_v2, %v528_v4  ;;  %v545_v8 = vld [vmem:[%s611_s20 + $0x34] sm:$0xf]  ;;  %v520_v9 = vld [vmem:[%s611_s20 + $0x38] sm:$0xf0]  ;;  %v519_v10 = vor.u32 %v546_v6, %v518_v5  ;;  %v510_v12 = vld [vmem:[%s611_s20 + $0x20] sm:$0xf] }
  0x12   : > { %292 = vmatpush.bf16.msra.mxu0 %v527_v3  ;;  %v523_v11 = vor.u32 %v545_v8, %v520_v9  ;;  %v544_v13 = vld [vmem:[%s611_s20 + $0x24] sm:$0xf0]  ;;  %v543_v14 = vld [vmem:[%s611_s20 + $0x24] sm:$0xf]  ;;  %v512_v15 = vld [vmem:[%s611_s20 + $0x28] sm:$0xf0]  ;;  %v560_v37 = vpop.eup %559 }
  0x13   : > { %305 = vmatpush.bf16.msra.mxu1 %v531_v7  ;;  %v511_v16 = vor.u32 %v544_v13, %v510_v12  ;;  %v515_v17 = vor.u32 %v543_v14, %v512_v15  ;;  %v502_v18 = vld [vmem:[%s611_s20 + $0x10] sm:$0xf]  ;;  %v542_v19 = vld [vmem:[%s611_s20 + $0x14] sm:$0xf0]  ;;  %v541_v20 = vld [vmem:[%s611_s20 + $0x14] sm:$0xf]  ;;  %vm325_vm1 = vweird.f32 %v560_v37 }
  0x14   : > { %v504_v21 = vld [vmem:[%s611_s20 + $0x18] sm:$0xf0]  ;;  %v503_v22 = vor.u32 %v542_v19, %v502_v18  ;;  %v494_v24 = vld [vmem:[%s611_s20] sm:$0xf]  ;;  %v540_v25 = vld [vmem:[%s611_s20 + $0x4] sm:$0xf0] }
  0x15   : > { %v507_v23 = vor.u32 %v541_v20, %v504_v21  ;;  %v539_v26 = vld [vmem:[%s611_s20 + $0x4] sm:$0xf]  ;;  %v496_v27 = vld [vmem:[%s611_s20 + $0x8] sm:$0xf0]  ;;  %v495_v28 = vor.u32 %v540_v25, %v494_v24  ;;  %v321_v38 = vmul.f32 256.0, %v560_v37 }
  0x16   : > { %293 = vmatpush.bf16.msra.mxu0 %v519_v10  ;;  %v499_v29 = vor.u32 %v539_v26, %v496_v27 }
  0x17   : > { %306 = vmatpush.bf16.msra.mxu1 %v523_v11  ;;  %v322_v39 = vsub.f32 1.0, %v321_v38 }
  0x19   : > { %v323_v40 = vmul.f32 %v560_v37, %v322_v39 }
  0x1a   : > { %294 = vmatpush.bf16.msra.mxu0 %v511_v16 }
  0x1b   : > { %307 = vmatpush.bf16.msra.mxu1 %v515_v17  ;;  %v324_v41 = vadd.f32 %v560_v37, %v323_v40 }
  0x1d   : > { %v326_v42 = vsel %vm325_vm1, %v560_v37, %v324_v41 }
  0x1e   : > { %295 = vmatpush.bf16.msra.mxu0 %v503_v22 }
  0x1f   : > { %308 = vmatpush.bf16.msra.mxu1 %v507_v23 }
  0x22   : > { %296 = vmatpush.bf16.msra.mxu0 %v495_v28 }
  0x23   : > { %309 = vmatpush.bf16.msra.mxu1 %v499_v29 }
  0x25   : > { %532 = vmatmul.msk.bf16.vlgmr.msra.gmra.mxu0 %vm285_vm0, %v224_v30 }
  0x26   : > { %533 = vmatmul.msk.bf16.vlgmr.msra.gmra.mxu1 %vm285_vm0, %v224_v30 }
  0xa2   : > { %v298_v31 = vpop.f32.mrf.mxu0 }
  0xa3   : > { %315 = vst [vmem:[%s212_s26] sm:$0xff] %v298_v31  ;;  %v311_v32 = vpop.f32.mrf.mxu1 }
  0xa4   : > { %316 = vst [vmem:[%s212_s26 + $0x8] sm:$0xff] %v311_v32  ;;  %v317_v33 = vadd.f32 %v311_v32, %v298_v31 }
  0xa6   : > { %318 = vadd.xlane.f32.xlu0 %v317_v33 }
  0xaa   : > { %v300_v34 = vpop.f32.mrf.mxu0 }
  0xab   : > { %v313_v35 = vpop.f32.mrf.mxu1 }
 0x119   : > { %v319_v43 = vpop.xlane.xlu0 %318 }
 0x11a   : > { %v327_v44 = vmul.f32 %v326_v42, %v319_v43 }
 0x11c   : > { %v328_v45 = vsub.f32 %v298_v31, %v327_v44  ;;  %v329_v46 = vsub.f32 %v311_v32, %v327_v44 }
 0x11e   : > { %v330_v47 = vmul.f32 %v328_v45, %v328_v45  ;;  %v331_v48 = vmul.f32 %v329_v46, %v329_v46 }
 0x120   : > { %v332_v49 = vadd.f32 %v331_v48, %v330_v47 }
 0x122   : > { %333 = vadd.xlane.f32.xlu0 %v332_v49 }
 0x195   : > { %v334_v50 = vpop.xlane.xlu0 %333 }
 0x196   : > { %v335_v51 = vmul.f32 %v334_v50, %v326_v42 }
 0x198   : > { %v336_v52 = vadd.f32 1e-05, %v335_v51 }
 0x19a   : > { %561 = vrsqrt.f32 %v336_v52  ;;  %vm343_vm3 = vweird.f32 %v336_v52 }
 0x1a0   : > { %v562_v53 = vpop.eup %561 }
 0x1a1   : > { %v338_v54 = vmul.f32 %v562_v53, %v336_v52  ;;  %vm344_vm2 = vweird.f32 %v562_v53 }
 0x1a2   : > { %vm345_vm4 = vmor %vm343_vm3, %vm344_vm2 }
 0x1a3   : > { %v339_v55 = vmul.f32 %v562_v53, %v338_v54 }
 0x1a5   : > { %v340_v56 = vmul.f32 0.5, %v339_v55 }
 0x1a7   : > { %v341_v57 = vsub.f32 1.5, %v340_v56 }
 0x1a9   : > { %v342_v58 = vmul.f32 %v562_v53, %v341_v57 }
 0x1ab   : > { %v346_v59 = vsel %vm345_vm4, %v562_v53, %v342_v58 }
 0x1ac   : > { %v347_v60 = vmul.f32 %v346_v59, %v328_v45  ;;  %v348_v61 = vmul.f32 %v346_v59, %v329_v46 }
 0x1ae   : > { %349 = vst [vmem:[%s217_s29] sm:$0xff] %v347_v60  ;;  %vm351_vm5 = vcmp.ge.f32.partialorder %v347_v60, 0.0  ;;  %vm352_vm6 = vcmp.ge.f32.partialorder %v348_v61, 0.0  ;;  %v353_v62 = vmul.f32 0.2, %v347_v60  ;;  %v354_v63 = vmul.f32 0.2, %v348_v61 }
 0x1af   : > { %350 = vst [vmem:[%s217_s29 + $0x8] sm:$0xff] %v348_v61 }
 0x1b0   : > { %v355_v0 = vsel %vm351_vm5, %v347_v60, %v353_v62  ;;  %v356_v1 = vsel %vm352_vm6, %v348_v61, %v354_v63 }
 0x1b1   : > { %357 = vst [vmem:[%s222_s6] sm:$0xff] %v355_v0 }
 0x1b2   : > { %358 = vst [vmem:[%s222_s6 + $0x8] sm:$0xff] %v356_v1 }
 0x1b3 PF: > { %s15_s15 = sadd.s32 1, %s569_s15  }
 0x1b4   : > { %p12_p4 = scmp.ge.s32.totalorder %s15_s15, 4  }
 0x1b6   :  { %14 = sbr.rel (!%p12_p4) target bundleno = 1 (0x1), region = 82 }

// kernel: fwd.9
= control target key start
LH: loop header
LB: loop body
LE: loop exit
PB: predicated region body
PF: predicated region fallthrough
CT: control target
= control target key end

     0   :  { %s402_s12 = smov 0   ;;  %s425_s0 = inlined_call_operand.vmem [shape: bf16[8,80], index: 0, kind: input, shape index: {}]   ;;  %s426_s1 = inlined_call_operand.vmem [shape: bf16[2,80,64], index: 1, kind: input, shape index: {}]   ;;  %s427_s2 = inlined_call_operand.vmem [shape: f32[2,8,64], index: 2, kind: output, shape index: {0}]   ;;  %s428_s3 = inlined_call_operand.vmem [shape: f32[2,8,64], index: 3, kind: output, shape index: {1}]  }
   0x1 LB: > { %s329_s13 = sadd.s32 4294967295, %s380_s12   ;;  %p333_p0 = scmp.ge.s32.totalorder %s380_s12, 1  ;;  %s380_s12 = sphi %s402_s12, %s14_s12  }
   0x2   : > { %p140_p1 = scmp.lt.s32.totalorder %s380_s12, 3 }
   0x4   : > { %p141_p2 = pnand %p333_p0, %p140_p1 }
   0x5   : > { %p167_p3 = scmp.lt.s32.totalorder (!%p141_p2), %s329_s13, 1 }
   0x6   : > { %144 = sbr.rel (%p141_p2) target bundleno = 169 (0xa9), region = 28 }
   0xb   : > { %s430_s13 = smov (!%p167_p3, %s329_s13), 1  ;;  %v181_v5 = vld [vmem:[%s425_s0] sm:$0xf]  ;;  %vm222_vm0 = vcmask 654336   ;;  %vm239_vm1 = vcmask 523264  }
   0xc   : > { %s365_s14 = smul.u32 40, %s430_s13  ;;  %s335_s20 = sshll.u32 %s430_s13, 3 }
   0xd   : > { %s175_s23 = scalar_lea.vmem %s427_s2, %s335_s20  ;;  %s179_s26 = scalar_lea.vmem %s428_s3, %s335_s20 }
   0xe   : > { %s171_s17 = scalar_lea.vmem %s426_s1, %s365_s14 }
   0xf   : > { %v364_v0 = vld [vmem:[%s171_s17 + $0x20] sm:$0xff]  ;;  %v363_v1 = vld [vmem:[%s171_s17 + $0x18] sm:$0xff]  ;;  %v362_v2 = vld [vmem:[%s171_s17 + $0x10] sm:$0xff] }
  0x10   : > { %229 = vmatpush.bf16.msra.mxu0 %v364_v0  ;;  %v361_v3 = vld [vmem:[%s171_s17 + $0x8] sm:$0xff]  ;;  %v360_v4 = vld [vmem:[%s171_s17] sm:$0xff] }
  0x14   : > { %230 = vmatpush.bf16.msra.mxu0 %v363_v1 }
  0x18   : > { %231 = vmatpush.bf16.msra.mxu0 %v362_v2 }
  0x1c   : > { %232 = vmatpush.bf16.msra.mxu0 %v361_v3 }
  0x20   : > { %233 = vmatpush.bf16.msra.mxu0 %v360_v4 }
  0x23   : > { %357 = vmatmul.msk.bf16.vlgmr.msra.gmra.mxu0 %vm222_vm0, %v181_v5 }
  0xa0   : > { %v235_v6 = vpop.f32.mrf.mxu0 }
  0xa1   : > { %240 = vst.msk [vmem:[%s175_s23] sm:$0xff] %vm239_vm1, %v235_v6  ;;  %vm241_vm2 = vcmp.ge.f32.partialorder %v235_v6, 0.0  ;;  %v242_v7 = vmul.f32 0.2, %v235_v6 }
  0xa3   : > { %v243_v8 = vsel %vm241_vm2, %v235_v6, %v242_v7 }
  0xa4   : > { %244 = vst.msk [vmem:[%s179_s26] sm:$0xff] %vm239_vm1, %v243_v8 }
  0xa8   : > { %v237_v9 = vpop.f32.mrf.mxu0 }
  0xa9 PF: > { %s14_s12 = sadd.s32 1, %s380_s12  }
  0xaa   : > { %p11_p4 = scmp.ge.s32.totalorder %s14_s12, 4  }
  0xac   :  { %13 = sbr.rel (!%p11_p4) target bundleno = 1 (0x1), region = 70 }

// kernel: fwd.10
= control target key start
LH: loop header
LB: loop body
LE: loop exit
PB: predicated region body
PF: predicated region fallthrough
CT: control target
= control target key end

     0   :  { %s753_s9 = smov 0   ;;  %s818_s0 = inlined_call_operand.vmem [shape: bf16[8,520], index: 0, kind: input, shape index: {}]   ;;  %s819_s1 = inlined_call_operand.vmem [shape: bf16[2,520,1], index: 1, kind: input, shape index: {}]   ;;  %s820_s2 = inlined_call_operand.vmem [shape: f32[2,8,1], index: 2, kind: output, shape index: {}]  }
   0x1 LB: > { %s551_s10 = sadd.s32 4294967295, %s736_s9   ;;  %p555_p0 = scmp.ge.s32.totalorder %s736_s9, 1  ;;  %s736_s9 = sphi %s753_s9, %s12_s9  }
   0x2   : > { %p112_p1 = scmp.lt.s32.totalorder %s736_s9, 3 }
   0x4   : > { %p113_p2 = pnand %p555_p0, %p112_p1 }
   0x5   : > { %p133_p3 = scmp.lt.s32.totalorder (!%p113_p2), %s551_s10, 1 }
   0x6   : > { %116 = sbr.rel (%p113_p2) target bundleno = 197 (0xc5), region = 28 }
   0xb   : > { %s822_s10 = smov (!%p133_p3, %s551_s10), 1  ;;  %v143_v28 = vld [vmem:[%s818_s0] sm:$0xff]  ;;  %v144_v31 = vld [vmem:[%s818_s0 + $0x8] sm:$0xff]  ;;  %vm427_vm0 = vcmask 1043456   ;;  %v145_v46 = vld [vmem:[%s818_s0 + $0x10] sm:$0xf] }
   0xc   : > { %s721_s11 = smul.u32 260, %s822_s10  ;;  %v214_v32 = vunpack.c.l.b16 %v143_v28  ;;  %v215_v33 = vunpack.c.h.b16 %v143_v28  ;;  %v216_v37 = vunpack.c.l.b16 %v144_v31  ;;  %v217_v38 = vunpack.c.h.b16 %v144_v31  ;;  %s557_s21 = sshll.u32 %s822_s10, 3 }
   0xd   : > { %v218_v47 = vunpack.c.l.b16 %v145_v46  ;;  %vm423_vm1 = vcmask 64512   ;;  %s141_s24 = scalar_lea.vmem %s820_s2, %s557_s21  ;;  %vm496_vm2 = vcmask 7168  }
   0xe   : > { %s767_s14 = scalar_lea.vmem %s819_s1, %s721_s11  ;;  %v219_v41 = vpack.c.b16 %v214_v32, %v214_v32  ;;  %v220_v42 = vpack.c.b16 %v215_v33, %v215_v33  ;;  %v221_v44 = vpack.c.b16 %v216_v37, %v216_v37  ;;  %v222_v45 = vpack.c.b16 %v217_v38, %v217_v38 }
   0xf   : > { %v696_v0 = vld [vmem:[%s767_s14 + $0x38] sm:$0xff]  ;;  %v695_v4 = vld [vmem:[%s767_s14 + $0x30] sm:$0xff]  ;;  %v694_v8 = vld [vmem:[%s767_s14 + $0x28] sm:$0xff]  ;;  %v223_v48 = vpack.c.b16 %v218_v47, %v218_v47 }
  0x10   : > { %v704_v1 = vld [vmem:[%s767_s14 + $0x78] sm:$0xff]  ;;  %431 = vmatpush.bf16.msra.mxu0 %v696_v0  ;;  %v703_v5 = vld [vmem:[%s767_s14 + $0x70] sm:$0xff]  ;;  %v702_v9 = vld [vmem:[%s767_s14 + $0x68] sm:$0xff] }
  0x11   : > { %v712_v2 = vld [vmem:[%s767_s14 + $0xb8] sm:$0xff]  ;;  %444 = vmatpush.bf16.msra.mxu1 %v704_v1  ;;  %v711_v6 = vld [vmem:[%s767_s14 + $0xb0] sm:$0xff]  ;;  %v710_v10 = vld [vmem:[%s767_s14 + $0xa8] sm:$0xff] }
  0x12   : > { %v720_v3 = vld [vmem:[%s767_s14 + $0xf8] sm:$0xff]  ;;  %457 = vmatpush.bf16.msra.mxu2 %v712_v2  ;;  %v719_v7 = vld [vmem:[%s767_s14 + $0xf0] sm:$0xff]  ;;  %v718_v11 = vld [vmem:[%s767_s14 + $0xe8] sm:$0xff] }
  0x13   : > { %470 = vmatpush.bf16.msra.mxu3 %v720_v3  ;;  %v693_v12 = vld [vmem:[%s767_s14 + $0x20] sm:$0xff]  ;;  %v692_v16 = vld [vmem:[%s767_s14 + $0x18] sm:$0xff]  ;;  %v691_v20 = vld [vmem:[%s767_s14 + $0x10] sm:$0xff] }
  0x14   : > { %432 = vmatpush.bf16.msra.mxu0 %v695_v4  ;;  %v701_v13 = vld [vmem:[%s767_s14 + $0x60] sm:$0xff]  ;;  %v700_v17 = vld [vmem:[%s767_s14 + $0x58] sm:$0xff]  ;;  %v699_v21 = vld [vmem:[%s767_s14 + $0x50] sm:$0xff] }
  0x15   : > { %445 = vmatpush.bf16.msra.mxu1 %v703_v5  ;;  %v709_v14 = vld [vmem:[%s767_s14 + $0xa0] sm:$0xff]  ;;  %v708_v18 = vld [vmem:[%s767_s14 + $0x98] sm:$0xff]  ;;  %v707_v23 = vld [vmem:[%s767_s14 + $0x90] sm:$0xff] }
  0x16   : > { %458 = vmatpush.bf16.msra.mxu2 %v711_v6  ;;  %v717_v15 = vld [vmem:[%s767_s14 + $0xe0] sm:$0xff]  ;;  %v716_v19 = vld [vmem:[%s767_s14 + $0xd8] sm:$0xff]  ;;  %v715_v24 = vld [vmem:[%s767_s14 + $0xd0] sm:$0xff] }
  0x17   : > { %471 = vmatpush.bf16.msra.mxu3 %v719_v7  ;;  %v210_v22 = vld [vmem:[%s767_s14 + $0x100] sm:$0xf]  ;;  %v690_v26 = vld [vmem:[%s767_s14 + $0x8] sm:$0xff] }
  0x18   : > { %433 = vmatpush.bf16.msra.mxu0 %v694_v8  ;;  %v357_v25 = vunpack.c.l.b16 %v210_v22  ;;  %v698_v27 = vld [vmem:[%s767_s14 + $0x48] sm:$0xff]  ;;  %v689_v35 = vld [vmem:[%s767_s14] sm:$0xff] }
  0x19   : > { %446 = vmatpush.bf16.msra.mxu1 %v702_v9  ;;  %v706_v29 = vld [vmem:[%s767_s14 + $0x88] sm:$0xff]  ;;  %v697_v36 = vld [vmem:[%s767_s14 + $0x40] sm:$0xff] }
  0x1a   : > { %459 = vmatpush.bf16.msra.mxu2 %v710_v10  ;;  %v714_v30 = vld [vmem:[%s767_s14 + $0xc8] sm:$0xff]  ;;  %v390_v34 = vpack.c.b16 %v357_v25, %v357_v25  ;;  %v705_v39 = vld [vmem:[%s767_s14 + $0x80] sm:$0xff] }
  0x1b   : > { %472 = vmatpush.bf16.msra.mxu3 %v718_v11  ;;  %v713_v40 = vld [vmem:[%s767_s14 + $0xc0] sm:$0xff] }
  0x1c   : > { %434 = vmatpush.bf16.msra.mxu0 %v693_v12  ;;  %v429_v43 = vsel %vm427_vm0, %v390_v34, 0 }
  0x1d   : > { %447 = vmatpush.bf16.msra.mxu1 %v701_v13 }
  0x1e   : > { %460 = vmatpush.bf16.msra.mxu2 %v709_v14 }
  0x1f   : > { %473 = vmatpush.bf16.msra.mxu3 %v717_v15 }
  0x20   : > { %435 = vmatpush.bf16.msra.mxu0 %v692_v16 }
  0x21   : > { %448 = vmatpush.bf16.msra.mxu1 %v700_v17 }
  0x22   : > { %461 = vmatpush.bf16.msra.mxu2 %v708_v18 }
  0x23   : > { %474 = vmatpush.bf16.msra.mxu3 %v716_v19 }
  0x24   : > { %436 = vmatpush.bf16.msra.mxu0 %v691_v20 }
  0x25   : > { %449 = vmatpush.bf16.msra.mxu1 %v699_v21 }
  0x26   : > { %462 = vmatpush.bf16.msra.mxu2 %v707_v23 }
  0x27   : > { %475 = vmatpush.bf16.msra.mxu3 %v715_v24 }
  0x28   : > { %437 = vmatpush.bf16.msra.mxu0 %v690_v26 }
  0x29   : > { %450 = vmatpush.bf16.msra.mxu1 %v698_v27 }
  0x2a   : > { %463 = vmatpush.bf16.msra.mxu2 %v706_v29 }
  0x2b   : > { %476 = vmatpush.bf16.msra.mxu3 %v714_v30 }
  0x2c   : > { %438 = vmatpush.bf16.msra.mxu0 %v689_v35 }
  0x2d   : > { %451 = vmatpush.bf16.msra.mxu1 %v697_v36 }
  0x2e   : > { %464 = vmatpush.bf16.msra.mxu2 %v705_v39 }
  0x2f   : > { %477 = vmatpush.bf16.msra.mxu3 %v713_v40  ;;  %439 = vmatmul.bf16.vlgmr.msra.gmra.mxu0 %v219_v41 }
  0x30   : > { %490 = vmatpush.bf16.msrb.mxu0 %v429_v43  ;;  %452 = vmatmul.bf16.vlgmr.msra.gmra.mxu1 %v220_v42 }
  0x31   : > { %465 = vmatmul.bf16.vlgmr.msra.gmra.mxu2 %v221_v44 }
  0x32   : > { %478 = vmatmul.bf16.vlgmr.msra.gmra.mxu3 %v222_v45 }
  0x3f   : > { %686 = vmatmul.msk.bf16.vlgmr.msrb.gmra.mxu0 %vm423_vm1, %v223_v48 }
  0xac   : > { %v440_v49 = vpop.f32.mrf.mxu0 }
  0xad   : > { %v453_v50 = vpop.f32.mrf.mxu1 }
  0xae   : > { %v454_v55 = vadd.f32 %v453_v50, %v440_v49 }
  0xb4   : > { %v466_v51 = vpop.f32.mrf.mxu2  ;;  %v442_v53 = vpop.f32.mrf.mxu0 }
  0xb5   : > { %v479_v52 = vpop.f32.mrf.mxu3  ;;  %v455_v54 = vpop.f32.mrf.mxu1  ;;  %v467_v56 = vadd.f32 %v466_v51, %v454_v55 }
  0xb7   : > { %v480_v57 = vadd.f32 %v479_v52, %v467_v56 }
  0xbc   : > { %v468_v58 = vpop.f32.mrf.mxu2  ;;  %v492_v60 = vpop.f32.mrf.mxu0 }
  0xbd   : > { %v481_v59 = vpop.f32.mrf.mxu3  ;;  %v493_v61 = vadd.f32 %v492_v60, %v480_v57 }
  0xbf   : > { %497 = vst.msk [vmem:[%s141_s24] sm:$0xff] %vm496_vm2, %v493_v61 }
  0xc4   : > { %v494_v62 = vpop.f32.mrf.mxu0 }
  0xc5 PF: > { %s12_s9 = sadd.s32 1, %s736_s9  }
  0xc6   : > { %p9_p4 = scmp.ge.s32.totalorder %s12_s9, 4  }
  0xc8   :  { %11 = sbr.rel (!%p9_p4) target bundleno = 1 (0x1), region = 58 }

// kernel: fwd.11
= control target key start
LH: loop header
LB: loop body
LE: loop exit
PB: predicated region body
PF: predicated region fallthrough
CT: control target
= control target key end

     0   :  { %s1432_s12 = smov 0   ;;  %s1673_s0 = inlined_call_operand.vmem [shape: bf16[8,152], index: 0, kind: input, shape index: {}]   ;;  %s1674_s1 = inlined_call_operand.vmem [shape: bf16[2,152,1024], index: 1, kind: input, shape index: {}]   ;;  %s1675_s2 = inlined_call_operand.vmem [shape: f32[2,8,1024], index: 2, kind: output, shape index: {0}]   ;;  %s1676_s3 = inlined_call_operand.vmem [shape: f32[2,8,1024], index: 3, kind: output, shape index: {1}]  }
   0x1 LB: > { %s1013_s13 = sadd.s32 4294967295, %s1410_s12   ;;  %p1017_p0 = scmp.ge.s32.totalorder %s1410_s12, 1  ;;  %s1410_s12 = sphi %s1432_s12, %s14_s12  }
   0x2   : > { %p140_p1 = scmp.lt.s32.totalorder %s1410_s12, 3 }
   0x4   : > { %p141_p2 = pnand %p1017_p0, %p140_p1 }
   0x5   : > { %p169_p3 = scmp.lt.s32.totalorder (!%p141_p2), %s1013_s13, 1 }
   0x6   : > { %144 = sbr.rel (%p141_p2) target bundleno = 250 (0xfa), region = 28 }
   0xb   : > { %s1678_s13 = smov (!%p169_p3, %s1013_s13), 1  ;;  %vm652_vm0 = vcmask 1043456   ;;  %v1454_v3 = vld [vmem:[%s1673_s0] sm:$0xff]  ;;  %vm648_vm1 = vcmask 195584  }
   0xc   : > { %s1395_s14 = smul.u32 608, %s1678_s13  ;;  %v264_v28 = vunpack.c.h.b16 %v1454_v3  ;;  %s1321_s20 = sshll.u32 %s1678_s13, 6 }
   0xd   : > { %s1647_s23 = scalar_lea.vmem %s1675_s2, %s1321_s20  ;;  %s1652_s26 = scalar_lea.vmem %s1676_s3, %s1321_s20 }
   0xe   : > { %s1446_s17 = scalar_lea.vmem %s1674_s1, %s1395_s14  ;;  %v1487_v47 = vpack.c.b16 %v264_v28, %v264_v28 }
   0xf   : > { %v1249_v0 = vld [vmem:[%s1446_s17 + $0x1c0] sm:$0xf]  ;;  %v1257_v6 = vld [vmem:[%s1446_s17 + $0x1c8] sm:$0xf]  ;;  %v1379_v19 = vld [vmem:[%s1446_s17 + $0x1c4] sm:$0xf] }
  0x10   : > { %v1383_v1 = vld [vmem:[%s1446_s17 + $0x1dc] sm:$0xf0]  ;;  %v1384_v7 = vld [vmem:[%s1446_s17 + $0x1e4] sm:$0xf0]  ;;  %v1251_v21 = vld [vmem:[%s1446_s17 + $0x1e0] sm:$0xf0] }
  0x11   : > { %v258_v2 = vld [vmem:[%s1446_s17 + $0x240] sm:$0xff]  ;;  %v1250_v4 = vor.u32 %v1383_v1, %v1249_v0  ;;  %v1258_v10 = vor.u32 %v1384_v7, %v1257_v6  ;;  %v1225_v17 = vld [vmem:[%s1446_s17 + $0x188] sm:$0xf]  ;;  %v1254_v34 = vor.u32 %v1379_v19, %v1251_v21  ;;  %v1380_v48 = vld [vmem:[%s1446_s17 + $0x1cc] sm:$0xf] }
  0x12   : > { %v488_v5 = vunpack.c.l.b16 %v258_v2  ;;  %v1217_v8 = vld [vmem:[%s1446_s17 + $0x180] sm:$0xf]  ;;  %v489_v9 = vunpack.c.h.b16 %v258_v2  ;;  %v1376_v18 = vld [vmem:[%s1446_s17 + $0x1a4] sm:$0xf0]  ;;  %v1387_v26 = vld [vmem:[%s1446_s17 + $0x204] sm:$0xf] }
  0x13   : > { %v1375_v11 = vld [vmem:[%s1446_s17 + $0x19c] sm:$0xf0]  ;;  %677 = vmatpush.bf16.msra.mxu0 %v1250_v4  ;;  %729 = vmatpush.bf16.msra.mxu1 %v1258_v10  ;;  %v1226_v20 = vor.u32 %v1376_v18, %v1225_v17  ;;  %v1283_v27 = vld [vmem:[%s1446_s17 + $0x220] sm:$0xf0]  ;;  %v1193_v31 = vld [vmem:[%s1446_s17 + $0x148] sm:$0xf] }
  0x14   : > { %v1281_v12 = vld [vmem:[%s1446_s17 + $0x200] sm:$0xf]  ;;  %v568_v14 = vpack.c.b16 %v488_v5, %v488_v5  ;;  %v1218_v15 = vor.u32 %v1375_v11, %v1217_v8  ;;  %v569_v16 = vpack.c.b16 %v489_v9, %v489_v9  ;;  %v1286_v30 = vor.u32 %v1387_v26, %v1283_v27  ;;  %v1368_v32 = vld [vmem:[%s1446_s17 + $0x164] sm:$0xf0]  ;;  %v1371_v37 = vld [vmem:[%s1446_s17 + $0x184] sm:$0xf] }
  0x15   : > { %v1391_v13 = vld [vmem:[%s1446_s17 + $0x21c] sm:$0xf0]  ;;  %v1476_v33 = vld [vmem:[%s1446_s17 + $0x248] sm:$0xff]  ;;  %v1219_v38 = vld [vmem:[%s1446_s17 + $0x1a0] sm:$0xf0]  ;;  %v1194_v39 = vor.u32 %v1368_v32, %v1193_v31 }
  0x16   : > { %v1185_v22 = vld [vmem:[%s1446_s17 + $0x140] sm:$0xf]  ;;  %v654_v24 = vsel %vm652_vm0, %v568_v14, 0  ;;  %v657_v25 = vsel %vm652_vm0, %v569_v16, 0  ;;  %v1282_v29 = vor.u32 %v1391_v13, %v1281_v12  ;;  %v490_v36 = vunpack.c.l.b16 %v1476_v33  ;;  %v1161_v42 = vld [vmem:[%s1446_s17 + $0x108] sm:$0xf] }
  0x17   : > { %v1367_v23 = vld [vmem:[%s1446_s17 + $0x15c] sm:$0xf0]  ;;  %696 = vmatpush.bf16.msra.mxu2 %v654_v24  ;;  %722 = vmatpush.bf16.msra.mxu3 %v657_v25  ;;  %v1360_v44 = vld [vmem:[%s1446_s17 + $0x124] sm:$0xf0]  ;;  %v1259_v49 = vld [vmem:[%s1446_s17 + $0x1e8] sm:$0xf0]  ;;  %v1222_v51 = vor.u32 %v1371_v37, %v1219_v38 }
  0x18   : > { %678 = vmatpush.bf16.msra.mxu0 %v1218_v15  ;;  %v1186_v35 = vor.u32 %v1367_v23, %v1185_v22  ;;  %730 = vmatpush.bf16.msra.mxu1 %v1226_v20  ;;  %v1153_v40 = vld [vmem:[%s1446_s17 + $0x100] sm:$0xf]  ;;  %v570_v43 = vpack.c.b16 %v490_v36, %v490_v36  ;;  %v1289_v45 = vld [vmem:[%s1446_s17 + $0x208] sm:$0xf]  ;;  %v1363_v53 = vld [vmem:[%s1446_s17 + $0x144] sm:$0xf]  ;;  %v1162_v54 = vor.u32 %v1360_v44, %v1161_v42  ;;  %v491_v20 = vunpack.c.h.b16 %v1476_v33 }
  0x19   : > { %v1359_v41 = vld [vmem:[%s1446_s17 + $0x11c] sm:$0xf0]  ;;  %v1392_v46 = vld [vmem:[%s1446_s17 + $0x224] sm:$0xf0]  ;;  %v1187_v56 = vld [vmem:[%s1446_s17 + $0x160] sm:$0xf0]  ;;  %v1262_v59 = vor.u32 %v1380_v48, %v1259_v49 }
  0x1a   : > { %v660_v50 = vsel %vm652_vm0, %v570_v43, 0  ;;  %v1154_v52 = vor.u32 %v1359_v41, %v1153_v40  ;;  %v1290_v55 = vor.u32 %v1392_v46, %v1289_v45  ;;  %v1121_v57 = vld [vmem:[%s1446_s17 + $0xc0] sm:$0xf]  ;;  %v1129_v60 = vld [vmem:[%s1446_s17 + $0xc8] sm:$0xf]  ;;  %v1190_v0 = vor.u32 %v1363_v53, %v1187_v56  ;;  %v260_v42 = vld [vmem:[%s1446_s17 + $0x250] sm:$0xff] }
  0x1b   : > { %697 = vmatpush.bf16.msra.mxu2 %v1282_v29  ;;  %723 = vmatpush.bf16.msra.mxu3 %v1286_v30  ;;  %v1351_v58 = vld [vmem:[%s1446_s17 + $0xdc] sm:$0xf0]  ;;  %v1352_v61 = vld [vmem:[%s1446_s17 + $0xe4] sm:$0xf0]  ;;  %v1372_v62 = vld [vmem:[%s1446_s17 + $0x18c] sm:$0xf]  ;;  %v571_v33 = vpack.c.b16 %v491_v20, %v491_v20  ;;  %v492_v48 = vunpack.c.l.b16 %v260_v42  ;;  %v493_v49 = vunpack.c.h.b16 %v260_v42 }
  0x1c   : > { %679 = vmatpush.bf16.msra.mxu0 %v1186_v35  ;;  %731 = vmatpush.bf16.msra.mxu1 %v1194_v39  ;;  %v1227_v63 = vld [vmem:[%s1446_s17 + $0x1a8] sm:$0xf0]  ;;  %v1122_v1 = vor.u32 %v1351_v58, %v1121_v57  ;;  %v1355_v2 = vld [vmem:[%s1446_s17 + $0x104] sm:$0xf]  ;;  %v1130_v4 = vor.u32 %v1352_v61, %v1129_v60  ;;  %v1089_v6 = vld [vmem:[%s1446_s17 + $0x80] sm:$0xf]  ;;  %v263_v39 = vunpack.c.l.b16 %v1454_v3 }
  0x1d   : > { %v1155_v5 = vld [vmem:[%s1446_s17 + $0x120] sm:$0xf0]  ;;  %v1343_v7 = vld [vmem:[%s1446_s17 + $0x9c] sm:$0xf0]  ;;  %v1230_v8 = vor.u32 %v1372_v62, %v1227_v63  ;;  %v1097_v9 = vld [vmem:[%s1446_s17 + $0x88] sm:$0xf]  ;;  %v572_v57 = vpack.c.b16 %v492_v48, %v492_v48 }
  0x1e   : > { %1312 = vmatmul.msk.bf16.vlgmr.msra.gmra.mxu3 %vm648_vm1, %v1487_v47  ;;  %1311 = vmatmul.msk.bf16.vlgmr.msra.gmra.mxu2 %vm648_vm1, %v1487_v47  ;;  %v1344_v10 = vld [vmem:[%s1446_s17 + $0xa4] sm:$0xf0]  ;;  %v1364_v11 = vld [vmem:[%s1446_s17 + $0x14c] sm:$0xf]  ;;  %v1158_v13 = vor.u32 %v1355_v2, %v1155_v5  ;;  %v1090_v14 = vor.u32 %v1343_v7, %v1089_v6  ;;  %v1347_v15 = vld [vmem:[%s1446_s17 + $0xc4] sm:$0xf]  ;;  %v1537_v53 = vpack.c.b16 %v263_v39, %v263_v39 }
  0x1f   : > { %703 = vmatpush.bf16.msrb.mxu2 %v1254_v34  ;;  %748 = vmatpush.bf16.msrb.mxu3 %v660_v50  ;;  %v1195_v12 = vld [vmem:[%s1446_s17 + $0x168] sm:$0xf0]  ;;  %v1098_v16 = vor.u32 %v1344_v10, %v1097_v9  ;;  %v1123_v17 = vld [vmem:[%s1446_s17 + $0xe0] sm:$0xf0]  ;;  %v1057_v18 = vld [vmem:[%s1446_s17 + $0x40] sm:$0xf] }
  0x20   : > { %680 = vmatpush.bf16.msra.mxu0 %v1154_v52  ;;  %732 = vmatpush.bf16.msra.mxu1 %v1162_v54  ;;  %v1335_v19 = vld [vmem:[%s1446_s17 + $0x5c] sm:$0xf0]  ;;  %v1198_v21 = vor.u32 %v1364_v11, %v1195_v12  ;;  %v1065_v22 = vld [vmem:[%s1446_s17 + $0x48] sm:$0xf]  ;;  %v1356_v24 = vld [vmem:[%s1446_s17 + $0x10c] sm:$0xf]  ;;  %v1126_v26 = vor.u32 %v1347_v15, %v1123_v17 }
  0x21   : > { %v1336_v23 = vld [vmem:[%s1446_s17 + $0x64] sm:$0xf0]  ;;  %v1163_v25 = vld [vmem:[%s1446_s17 + $0x128] sm:$0xf0]  ;;  %v1058_v27 = vor.u32 %v1335_v19, %v1057_v18  ;;  %v1339_v28 = vld [vmem:[%s1446_s17 + $0x84] sm:$0xf] }
  0x22   : > { %v1066_v29 = vor.u32 %v1336_v23, %v1065_v22  ;;  %v1091_v30 = vld [vmem:[%s1446_s17 + $0xa0] sm:$0xf0]  ;;  %v1025_v31 = vld [vmem:[%s1446_s17] sm:$0xf]  ;;  %v1166_v34 = vor.u32 %v1356_v24, %v1163_v25  ;;  %v1033_v35 = vld [vmem:[%s1446_s17 + $0x8] sm:$0xf] }
  0x23   : > { %704 = vmatpush.bf16.msrb.mxu2 %v1222_v51  ;;  %749 = vmatpush.bf16.msrb.mxu3 %v1290_v55  ;;  %v1327_v32 = vld [vmem:[%s1446_s17 + $0x1c] sm:$0xf0]  ;;  %v1328_v36 = vld [vmem:[%s1446_s17 + $0x24] sm:$0xf0]  ;;  %v1348_v37 = vld [vmem:[%s1446_s17 + $0xcc] sm:$0xf]  ;;  %v1094_v40 = vor.u32 %v1339_v28, %v1091_v30 }
  0x24   : > { %681 = vmatpush.bf16.msra.mxu0 %v1122_v1  ;;  %733 = vmatpush.bf16.msra.mxu1 %v1130_v4  ;;  %v1131_v38 = vld [vmem:[%s1446_s17 + $0xe8] sm:$0xf0]  ;;  %v1026_v41 = vor.u32 %v1327_v32, %v1025_v31  ;;  %v663_v43 = vsel %vm652_vm0, %v571_v33, 0  ;;  %v1034_v44 = vor.u32 %v1328_v36, %v1033_v35  ;;  %v1331_v45 = vld [vmem:[%s1446_s17 + $0x44] sm:$0xf]  ;;  %v573_v1 = vpack.c.b16 %v493_v49, %v493_v49 }
  0x25   : > { %v1059_v46 = vld [vmem:[%s1446_s17 + $0x60] sm:$0xf0]  ;;  %v1134_v3 = vor.u32 %v1348_v37, %v1131_v38  ;;  %v1388_v50 = vld [vmem:[%s1446_s17 + $0x20c] sm:$0xf]  ;;  %v1381_v52 = vld [vmem:[%s1446_s17 + $0x1d4] sm:$0xf] }
  0x26   : > { %v1291_v51 = vld [vmem:[%s1446_s17 + $0x228] sm:$0xf0]  ;;  %v1267_v54 = vld [vmem:[%s1446_s17 + $0x1f0] sm:$0xf0]  ;;  %v1062_v58 = vor.u32 %v1331_v45, %v1059_v46  ;;  %v1393_v60 = vld [vmem:[%s1446_s17 + $0x22c] sm:$0xf0] }
  0x27   : > { %755 = vmatpush.bf16.msra.mxu3 %v1262_v59  ;;  %705 = vmatpush.bf16.msrb.mxu2 %v1190_v0  ;;  %v1340_v55 = vld [vmem:[%s1446_s17 + $0x8c] sm:$0xf]  ;;  %v1297_v59 = vld [vmem:[%s1446_s17 + $0x210] sm:$0xf]  ;;  %v1294_v61 = vor.u32 %v1388_v50, %v1291_v51  ;;  %v1323_v62 = vld [vmem:[%s1446_s17 + $0x4] sm:$0xf]  ;;  %v1270_v2 = vor.u32 %v1381_v52, %v1267_v54 }
  0x28   : > { %682 = vmatpush.bf16.msra.mxu0 %v1090_v14  ;;  %734 = vmatpush.bf16.msra.mxu1 %v1098_v16  ;;  %v1099_v56 = vld [vmem:[%s1446_s17 + $0xa8] sm:$0xf0]  ;;  %v1027_v63 = vld [vmem:[%s1446_s17 + $0x20] sm:$0xf0]  ;;  %v666_v0 = vsel %vm652_vm0, %v572_v57, 0  ;;  %v1298_v11 = vor.u32 %v1393_v60, %v1297_v59  ;;  %v669_v14 = vsel %vm652_vm0, %v573_v1, 0 }
  0x29   : > { %v1102_v4 = vor.u32 %v1340_v55, %v1099_v56  ;;  %v1265_v5 = vld [vmem:[%s1446_s17 + $0x1d0] sm:$0xf]  ;;  %v1373_v7 = vld [vmem:[%s1446_s17 + $0x194] sm:$0xf]  ;;  %v1332_v9 = vld [vmem:[%s1446_s17 + $0x4c] sm:$0xf]  ;;  %v1030_v12 = vor.u32 %v1323_v62, %v1027_v63 }
  0x2a   : > { %v1385_v6 = vld [vmem:[%s1446_s17 + $0x1ec] sm:$0xf0]  ;;  %v1067_v10 = vld [vmem:[%s1446_s17 + $0x68] sm:$0xf0]  ;;  %v1389_v15 = vld [vmem:[%s1446_s17 + $0x214] sm:$0xf] }
  0x2b   : > { %756 = vmatpush.bf16.msra.mxu3 %v1230_v8  ;;  %706 = vmatpush.bf16.msrb.mxu2 %v1158_v13  ;;  %v1235_v8 = vld [vmem:[%s1446_s17 + $0x1b0] sm:$0xf0]  ;;  %v1266_v13 = vor.u32 %v1385_v6, %v1265_v5  ;;  %v1070_v18 = vor.u32 %v1332_v9, %v1067_v10  ;;  %v1233_v19 = vld [vmem:[%s1446_s17 + $0x190] sm:$0xf]  ;;  %v1324_v23 = vld [vmem:[%s1446_s17 + $0xc] sm:$0xf] }
  0x2c   : > { %683 = vmatpush.bf16.msra.mxu0 %v1058_v27  ;;  %735 = vmatpush.bf16.msra.mxu1 %v1066_v29  ;;  %v1299_v16 = vld [vmem:[%s1446_s17 + $0x230] sm:$0xf0]  ;;  %v1238_v17 = vor.u32 %v1373_v7, %v1235_v8  ;;  %v1377_v20 = vld [vmem:[%s1446_s17 + $0x1ac] sm:$0xf0]  ;;  %v1035_v24 = vld [vmem:[%s1446_s17 + $0x28] sm:$0xf0] }
  0x2d   : > { %v1203_v22 = vld [vmem:[%s1446_s17 + $0x170] sm:$0xf0]  ;;  %v1273_v25 = vld [vmem:[%s1446_s17 + $0x1d8] sm:$0xf]  ;;  %v1302_v27 = vor.u32 %v1389_v15, %v1299_v16  ;;  %v1234_v28 = vor.u32 %v1377_v20, %v1233_v19  ;;  %v1038_v30 = vor.u32 %v1324_v23, %v1035_v24  ;;  %v1201_v31 = vld [vmem:[%s1446_s17 + $0x150] sm:$0xf] }
  0x2e   : > { %1313 = vmatmul.msk.bf16.vlgmr.msrb.gmra.mxu3 %vm648_vm1, %v1487_v47  ;;  %v1369_v32 = vld [vmem:[%s1446_s17 + $0x16c] sm:$0xf0]  ;;  %v1171_v35 = vld [vmem:[%s1446_s17 + $0x130] sm:$0xf0]  ;;  %v1241_v36 = vld [vmem:[%s1446_s17 + $0x198] sm:$0xf] }
  0x2f   : > { %757 = vmatpush.bf16.msra.mxu3 %v1198_v21  ;;  %707 = vmatpush.bf16.msrb.mxu2 %v1126_v26  ;;  %v1365_v21 = vld [vmem:[%s1446_s17 + $0x154] sm:$0xf]  ;;  %v1386_v26 = vld [vmem:[%s1446_s17 + $0x1f4] sm:$0xf0]  ;;  %v1202_v38 = vor.u32 %v1369_v32, %v1201_v31  ;;  %v1169_v39 = vld [vmem:[%s1446_s17 + $0x110] sm:$0xf] }
  0x30   : > { %684 = vmatpush.bf16.msra.mxu0 %v1026_v41  ;;  %736 = vmatpush.bf16.msra.mxu1 %v1034_v44  ;;  %v1206_v29 = vor.u32 %v1365_v21, %v1203_v22  ;;  %v1274_v33 = vor.u32 %v1386_v26, %v1273_v25  ;;  %v1378_v37 = vld [vmem:[%s1446_s17 + $0x1b4] sm:$0xf0]  ;;  %v1361_v41 = vld [vmem:[%s1446_s17 + $0x12c] sm:$0xf0]  ;;  %v1382_v42 = vld [vmem:[%s1446_s17 + $0x1dc] sm:$0xf] }
  0x31   : > { %v1242_v44 = vor.u32 %v1378_v37, %v1241_v36  ;;  %v1349_v45 = vld [vmem:[%s1446_s17 + $0xd4] sm:$0xf]  ;;  %v1209_v48 = vld [vmem:[%s1446_s17 + $0x158] sm:$0xf]  ;;  %v1137_v51 = vld [vmem:[%s1446_s17 + $0xd0] sm:$0xf] }
  0x32   : > { %v1139_v46 = vld [vmem:[%s1446_s17 + $0xf0] sm:$0xf0]  ;;  %v1370_v49 = vld [vmem:[%s1446_s17 + $0x174] sm:$0xf0]  ;;  %v1353_v54 = vld [vmem:[%s1446_s17 + $0xec] sm:$0xf0] }
  0x33   : > { %758 = vmatpush.bf16.msra.mxu3 %v1166_v34  ;;  %708 = vmatpush.bf16.msrb.mxu2 %v1094_v40  ;;  %v1357_v34 = vld [vmem:[%s1446_s17 + $0x114] sm:$0xf]  ;;  %v1142_v52 = vor.u32 %v1349_v45, %v1139_v46  ;;  %v1374_v55 = vld [vmem:[%s1446_s17 + $0x19c] sm:$0xf]  ;;  %v1210_v57 = vor.u32 %v1370_v49, %v1209_v48  ;;  %v1177_v60 = vld [vmem:[%s1446_s17 + $0x118] sm:$0xf]  ;;  %v1138_v62 = vor.u32 %v1353_v54, %v1137_v51 }
  0x34   : > { %774 = vmatpush.bf16.msrb.mxu0 %v663_v43  ;;  %800 = vmatpush.bf16.msrb.mxu1 %v666_v0  ;;  %v1174_v40 = vor.u32 %v1357_v34, %v1171_v35  ;;  %v1275_v43 = vld [vmem:[%s1446_s17 + $0x1f8] sm:$0xf0]  ;;  %v1107_v59 = vld [vmem:[%s1446_s17 + $0xb0] sm:$0xf0]  ;;  %v1105_v0 = vld [vmem:[%s1446_s17 + $0x90] sm:$0xf] }
  0x35   : > { %685 = vmatmul.bf16.vlgmr.msra.gmra.mxu0 %v1537_v53  ;;  %737 = vmatmul.bf16.vlgmr.msra.gmra.mxu1 %v1537_v53  ;;  %v1278_v50 = vor.u32 %v1382_v42, %v1275_v43  ;;  %v1243_v56 = vld [vmem:[%s1446_s17 + $0x1b8] sm:$0xf0]  ;;  %v1333_v8 = vld [vmem:[%s1446_s17 + $0x54] sm:$0xf]  ;;  %v1145_v10 = vld [vmem:[%s1446_s17 + $0xd8] sm:$0xf] }
  0x36   : > { %v1246_v63 = vor.u32 %v1374_v55, %v1243_v56  ;;  %v261_v1 = vld [vmem:[%s1446_s17 + $0x258] sm:$0xff]  ;;  %v1075_v9 = vld [vmem:[%s1446_s17 + $0x70] sm:$0xf0]  ;;  %v1073_v15 = vld [vmem:[%s1446_s17 + $0x50] sm:$0xf] }
  0x37   : > { %759 = vmatpush.bf16.msra.mxu3 %v1134_v3  ;;  %709 = vmatpush.bf16.msrb.mxu2 %v1062_v58  ;;  %v1170_v3 = vor.u32 %v1361_v41, %v1169_v39  ;;  %v1341_v58 = vld [vmem:[%s1446_s17 + $0x94] sm:$0xf]  ;;  %v1366_v5 = vld [vmem:[%s1446_s17 + $0x15c] sm:$0xf]  ;;  %v1078_v16 = vor.u32 %v1333_v8, %v1075_v9  ;;  %v494_v23 = vunpack.c.l.b16 %v261_v1  ;;  %v1113_v24 = vld [vmem:[%s1446_s17 + $0x98] sm:$0xf] }
  0x38   : > { %775 = vmatpush.bf16.msrb.mxu0 %v1294_v61  ;;  %801 = vmatpush.bf16.msrb.mxu1 %v1298_v11  ;;  %v1362_v61 = vld [vmem:[%s1446_s17 + $0x134] sm:$0xf0]  ;;  %v1211_v6 = vld [vmem:[%s1446_s17 + $0x178] sm:$0xf0]  ;;  %v1325_v21 = vld [vmem:[%s1446_s17 + $0x14] sm:$0xf] }
  0x39   : > { %v1178_v7 = vor.u32 %v1362_v61, %v1177_v60  ;;  %v1354_v11 = vld [vmem:[%s1446_s17 + $0xf4] sm:$0xf0]  ;;  %v1179_v19 = vld [vmem:[%s1446_s17 + $0x138] sm:$0xf0]  ;;  %v1043_v22 = vld [vmem:[%s1446_s17 + $0x30] sm:$0xf0]  ;;  %v574_v35 = vpack.c.b16 %v494_v23, %v494_v23 }
  0x3a   : > { %v1146_v20 = vor.u32 %v1354_v11, %v1145_v10  ;;  %v1346_v25 = vld [vmem:[%s1446_s17 + $0xb4] sm:$0xf0]  ;;  %v1329_v31 = vld [vmem:[%s1446_s17 + $0x2c] sm:$0xf0]  ;;  %v1350_v32 = vld [vmem:[%s1446_s17 + $0xdc] sm:$0xf] }
  0x3b   : > { %760 = vmatpush.bf16.msra.mxu3 %v1102_v4  ;;  %710 = vmatpush.bf16.msrb.mxu2 %v1030_v12  ;;  %v1345_v4 = vld [vmem:[%s1446_s17 + $0xac] sm:$0xf0]  ;;  %v495_v12 = vunpack.c.h.b16 %v261_v1  ;;  %v1147_v34 = vld [vmem:[%s1446_s17 + $0xf8] sm:$0xf0]  ;;  %v1081_v36 = vld [vmem:[%s1446_s17 + $0x58] sm:$0xf] }
  0x3c   : > { %807 = vmatpush.bf16.msra.mxu0 %v1270_v2  ;;  %826 = vmatpush.bf16.msra.mxu1 %v669_v14  ;;  %v1110_v2 = vor.u32 %v1341_v58, %v1107_v59  ;;  %v1214_v14 = vor.u32 %v1366_v5, %v1211_v6  ;;  %v1338_v37 = vld [vmem:[%s1446_s17 + $0x74] sm:$0xf0]  ;;  %v1390_v39 = vld [vmem:[%s1446_s17 + $0x21c] sm:$0xf]  ;;  %v1150_v42 = vor.u32 %v1350_v32, %v1147_v34  ;;  %v672_v45 = vsel %vm652_vm0, %v574_v35, 0 }
  0x3d   : > { %v575_v26 = vpack.c.b16 %v495_v12, %v495_v12  ;;  %v1342_v43 = vld [vmem:[%s1446_s17 + $0x9c] sm:$0xf]  ;;  %v1082_v46 = vor.u32 %v1338_v37, %v1081_v36  ;;  %v1305_v48 = vld [vmem:[%s1446_s17 + $0x218] sm:$0xf] }
  0x3e   : > { %711 = vmatmul.bf16.vlgmr.msrb.gmra.mxu2 %v1537_v53  ;;  %v1394_v49 = vld [vmem:[%s1446_s17 + $0x234] sm:$0xf0]  ;;  %v1334_v56 = vld [vmem:[%s1446_s17 + $0x5c] sm:$0xf] }
  0x3f   : > { %781 = vmatpush.bf16.msra.mxu2 %v1266_v13  ;;  %761 = vmatpush.bf16.msra.mxu3 %v1070_v18  ;;  %v1106_v13 = vor.u32 %v1345_v4, %v1105_v0  ;;  %v1358_v18 = vld [vmem:[%s1446_s17 + $0x11c] sm:$0xf]  ;;  %v1330_v51 = vld [vmem:[%s1446_s17 + $0x34] sm:$0xf0]  ;;  %v1306_v54 = vor.u32 %v1394_v49, %v1305_v48 }
  0x40   : > { %808 = vmatpush.bf16.msra.mxu0 %v1238_v17  ;;  %827 = vmatpush.bf16.msra.mxu1 %v1302_v27  ;;  %v1337_v17 = vld [vmem:[%s1446_s17 + $0x6c] sm:$0xf0]  ;;  %v1326_v59 = vld [vmem:[%s1446_s17 + $0x1c] sm:$0xf] }
  0x41   : > { %v1074_v27 = vor.u32 %v1337_v17, %v1073_v15  ;;  %v1051_v60 = vld [vmem:[%s1446_s17 + $0x38] sm:$0xf0] }
  0x42   : > { %v1054_v61 = vor.u32 %v1326_v59, %v1051_v60 }
  0x43   : > { %782 = vmatpush.bf16.msra.mxu2 %v1234_v28  ;;  %762 = vmatpush.bf16.msra.mxu3 %v1038_v30  ;;  %v1182_v28 = vor.u32 %v1358_v18, %v1179_v19  ;;  %v1041_v30 = vld [vmem:[%s1446_s17 + $0x10] sm:$0xf] }
  0x44   : > { %809 = vmatpush.bf16.msra.mxu0 %v1206_v29  ;;  %v1046_v29 = vor.u32 %v1325_v21, %v1043_v22  ;;  %v1042_v41 = vor.u32 %v1329_v31, %v1041_v30 }
  0x45   : > { %1314 = vmatmul.msk.bf16.vlgmr.msrb.gmra.mxu0 %vm648_vm1, %v1487_v47  ;;  %1315 = vmatmul.msk.bf16.vlgmr.msrb.gmra.mxu1 %vm648_vm1, %v1487_v47 }
  0x46   : > { %763 = vmatmul.bf16.vlgmr.msra.gmra.mxu3 %v1537_v53  ;;  %859 = vmatpush.bf16.msrb.mxu1 %v1278_v50  ;;  %v1049_v50 = vld [vmem:[%s1446_s17 + $0x18] sm:$0xf] }
  0x47   : > { %833 = vmatpush.bf16.msrb.mxu3 %v1274_v33  ;;  %783 = vmatpush.bf16.msra.mxu2 %v1202_v38  ;;  %v1114_v33 = vor.u32 %v1346_v25, %v1113_v24  ;;  %v675_v38 = vsel %vm652_vm0, %v575_v26, 0  ;;  %v1050_v55 = vor.u32 %v1330_v51, %v1049_v50 }
  0x48   : > { %810 = vmatpush.bf16.msra.mxu0 %v1174_v40  ;;  %v1307_v40 = vld [vmem:[%s1446_s17 + $0x238] sm:$0xf0] }
  0x4a   : > { %860 = vmatpush.bf16.msrb.mxu1 %v1246_v63 }
  0x4b   : > { %834 = vmatpush.bf16.msrb.mxu3 %v1242_v44  ;;  %784 = vmatpush.bf16.msra.mxu2 %v1170_v3  ;;  %v1115_v44 = vld [vmem:[%s1446_s17 + $0xb8] sm:$0xf0]  ;;  %v1310_v3 = vor.u32 %v1390_v39, %v1307_v40 }
  0x4c   : > { %811 = vmatpush.bf16.msra.mxu0 %v1142_v52  ;;  %v1118_v52 = vor.u32 %v1342_v43, %v1115_v44 }
  0x4e   : > { %861 = vmatpush.bf16.msrb.mxu1 %v1214_v14 }
  0x4f   : > { %835 = vmatpush.bf16.msrb.mxu3 %v1210_v57  ;;  %785 = vmatpush.bf16.msra.mxu2 %v1138_v62  ;;  %v1083_v57 = vld [vmem:[%s1446_s17 + $0x78] sm:$0xf0] }
  0x50   : > { %812 = vmatpush.bf16.msra.mxu0 %v1110_v2  ;;  %v1086_v58 = vor.u32 %v1334_v56, %v1083_v57 }
  0x52   : > { %862 = vmatpush.bf16.msrb.mxu1 %v1182_v28 }
  0x53   : > { %836 = vmatpush.bf16.msrb.mxu3 %v1178_v7  ;;  %786 = vmatpush.bf16.msra.mxu2 %v1106_v13 }
  0x54   : > { %813 = vmatpush.bf16.msra.mxu0 %v1078_v16 }
  0x55   : > { %1316 = vmatmul.msk.bf16.vlgmr.msra.gmra.mxu1 %vm648_vm1, %v1487_v47 }
  0x56   : > { %863 = vmatpush.bf16.msrb.mxu1 %v1150_v42 }
  0x57   : > { %837 = vmatpush.bf16.msrb.mxu3 %v1146_v20  ;;  %787 = vmatpush.bf16.msra.mxu2 %v1074_v27 }
  0x58   : > { %814 = vmatpush.bf16.msra.mxu0 %v1046_v29 }
  0x5a   : > { %864 = vmatpush.bf16.msrb.mxu1 %v1118_v52 }
  0x5b   : > { %838 = vmatpush.bf16.msrb.mxu3 %v1114_v33  ;;  %788 = vmatpush.bf16.msra.mxu2 %v1042_v41 }
  0x5c   : > { %878 = vmatpush.bf16.msrb.mxu0 %v675_v38 }
  0x5d   : > { %815 = vmatmul.bf16.vlgmr.msra.gmra.mxu0 %v1537_v53 }
  0x5e   : > { %789 = vmatmul.bf16.vlgmr.msra.gmra.mxu2 %v1537_v53  ;;  %865 = vmatpush.bf16.msrb.mxu1 %v1086_v58 }
  0x5f   : > { %852 = vmatpush.bf16.msrb.mxu2 %v672_v45  ;;  %839 = vmatpush.bf16.msrb.mxu3 %v1082_v46 }
  0x60   : > { %879 = vmatpush.bf16.msrb.mxu0 %v1310_v3 }
  0x62   : > { %866 = vmatpush.bf16.msrb.mxu1 %v1054_v61 }
  0x63   : > { %853 = vmatpush.bf16.msrb.mxu2 %v1306_v54  ;;  %840 = vmatpush.bf16.msrb.mxu3 %v1050_v55 }
  0x65   : > { %867 = vmatmul.bf16.vlgmr.msrb.gmra.mxu1 %v1537_v53 }
  0x66   : > { %841 = vmatmul.bf16.vlgmr.msrb.gmra.mxu3 %v1537_v53 }
  0x6d   : > { %1318 = vmatmul.msk.bf16.vlgmr.msrb.gmra.mxu0 %vm648_vm1, %v1487_v47 }
  0x6e   : > { %1317 = vmatmul.msk.bf16.vlgmr.msrb.gmra.mxu2 %vm648_vm1, %v1487_v47 }
  0xa1   : > { %v725_v62 = vpop.f32.mrf.mxu3  ;;  %v699_v63 = vpop.f32.mrf.mxu2 }
  0xa9   : > { %v727_v0 = vpop.f32.mrf.mxu3  ;;  %v701_v1 = vpop.f32.mrf.mxu2 }
  0xb1   : > { %v751_v5 = vpop.f32.mrf.mxu3 }
  0xb2   : > { %v686_v2 = vpop.f32.mrf.mxu0  ;;  %v738_v4 = vpop.f32.mrf.mxu1 }
  0xb3   : > { %v700_v53 = vadd.f32 %v699_v63, %v686_v2  ;;  %v752_v6 = vadd.f32 %v751_v5, %v738_v4 }
  0xb5   : > { %885 = vst [vmem:[%s1647_s23] sm:$0xff] %v700_v53  ;;  %vm893_vm2 = vcmp.ge.f32.partialorder %v700_v53, 0.0  ;;  %v901_v47 = vmul.f32 0.2, %v700_v53  ;;  %vm895_vm3 = vcmp.ge.f32.partialorder %v752_v6, 0.0  ;;  %v903_v8 = vmul.f32 0.2, %v752_v6 }
  0xb6   : > { %887 = vst [vmem:[%s1647_s23 + $0x10] sm:$0xff] %v752_v6 }
  0xb7   : > { %v909_v7 = vsel %vm893_vm2, %v700_v53, %v901_v47  ;;  %v911_v9 = vsel %vm895_vm3, %v752_v6, %v903_v8 }
  0xb8   : > { %917 = vst [vmem:[%s1652_s26] sm:$0xff] %v909_v7 }
  0xb9   : > { %919 = vst [vmem:[%s1652_s26 + $0x10] sm:$0xff] %v911_v9  ;;  %v753_v12 = vpop.f32.mrf.mxu3 }
  0xba   : > { %v688_v10 = vpop.f32.mrf.mxu0  ;;  %v740_v11 = vpop.f32.mrf.mxu1 }
  0xc1   : > { %v712_v13 = vpop.f32.mrf.mxu2 }
  0xc2   : > { %v726_v14 = vadd.f32 %v725_v62, %v712_v13  ;;  %v777_v15 = vpop.f32.mrf.mxu0  ;;  %v803_v17 = vpop.f32.mrf.mxu1 }
  0xc4   : > { %886 = vst [vmem:[%s1647_s23 + $0x8] sm:$0xff] %v726_v14  ;;  %vm894_vm4 = vcmp.ge.f32.partialorder %v726_v14, 0.0  ;;  %v902_v16 = vmul.f32 0.2, %v726_v14 }
  0xc6   : > { %v910_v18 = vsel %vm894_vm4, %v726_v14, %v902_v16 }
  0xc7   : > { %918 = vst [vmem:[%s1652_s26 + $0x8] sm:$0xff] %v910_v18 }
  0xc9   : > { %v764_v19 = vpop.f32.mrf.mxu3  ;;  %v714_v21 = vpop.f32.mrf.mxu2 }
  0xca   : > { %v778_v20 = vadd.f32 %v777_v15, %v764_v19  ;;  %v779_v23 = vpop.f32.mrf.mxu0  ;;  %v805_v25 = vpop.f32.mrf.mxu1 }
  0xcc   : > { %888 = vst [vmem:[%s1647_s23 + $0x18] sm:$0xff] %v778_v20  ;;  %vm896_vm5 = vcmp.ge.f32.partialorder %v778_v20, 0.0  ;;  %v904_v22 = vmul.f32 0.2, %v778_v20 }
  0xce   : > { %v912_v24 = vsel %vm896_vm5, %v778_v20, %v904_v22 }
  0xcf   : > { %920 = vst [vmem:[%s1652_s26 + $0x18] sm:$0xff] %v912_v24 }
  0xd1   : > { %v766_v26 = vpop.f32.mrf.mxu3 }
  0xd2   : > { %v829_v27 = vpop.f32.mrf.mxu1 }
  0xda   : > { %v816_v28 = vpop.f32.mrf.mxu0  ;;  %v831_v32 = vpop.f32.mrf.mxu1 }
  0xdb   : > { %v830_v29 = vadd.f32 %v829_v27, %v816_v28 }
  0xdd   : > { %890 = vst [vmem:[%s1647_s23 + $0x28] sm:$0xff] %v830_v29  ;;  %vm898_vm6 = vcmp.ge.f32.partialorder %v830_v29, 0.0  ;;  %v906_v30 = vmul.f32 0.2, %v830_v29 }
  0xdf   : > { %v914_v31 = vsel %vm898_vm6, %v830_v29, %v906_v30 }
  0xe0   : > { %922 = vst [vmem:[%s1652_s26 + $0x28] sm:$0xff] %v914_v31 }
  0xe1   : > { %v790_v34 = vpop.f32.mrf.mxu2 }
  0xe2   : > { %v818_v33 = vpop.f32.mrf.mxu0  ;;  %v804_v35 = vadd.f32 %v803_v17, %v790_v34  ;;  %v868_v39 = vpop.f32.mrf.mxu1 }
  0xe4   : > { %889 = vst [vmem:[%s1647_s23 + $0x20] sm:$0xff] %v804_v35  ;;  %vm897_vm7 = vcmp.ge.f32.partialorder %v804_v35, 0.0  ;;  %v905_v36 = vmul.f32 0.2, %v804_v35 }
  0xe6   : > { %v913_v37 = vsel %vm897_vm7, %v804_v35, %v905_v36 }
  0xe7   : > { %921 = vst [vmem:[%s1652_s26 + $0x20] sm:$0xff] %v913_v37 }
  0xe9   : > { %v842_v38 = vpop.f32.mrf.mxu3  ;;  %v792_v41 = vpop.f32.mrf.mxu2 }
  0xea   : > { %v881_v40 = vpop.f32.mrf.mxu0  ;;  %v870_v46 = vpop.f32.mrf.mxu1 }
  0xeb   : > { %v882_v42 = vadd.f32 %v881_v40, %v868_v39 }
  0xed   : > { %892 = vst [vmem:[%s1647_s23 + $0x38] sm:$0xff] %v882_v42  ;;  %vm900_vm8 = vcmp.ge.f32.partialorder %v882_v42, 0.0  ;;  %v908_v43 = vmul.f32 0.2, %v882_v42 }
  0xef   : > { %v916_v44 = vsel %vm900_vm8, %v882_v42, %v908_v43 }
  0xf0   : > { %924 = vst [vmem:[%s1652_s26 + $0x38] sm:$0xff] %v916_v44 }
  0xf1   : > { %v844_v45 = vpop.f32.mrf.mxu3  ;;  %v855_v49 = vpop.f32.mrf.mxu2 }
  0xf2   : > { %v883_v48 = vpop.f32.mrf.mxu0  ;;  %v856_v3 = vadd.f32 %v855_v49, %v842_v38 }
  0xf4   : > { %891 = vst [vmem:[%s1647_s23 + $0x30] sm:$0xff] %v856_v3  ;;  %vm899_vm9 = vcmp.ge.f32.partialorder %v856_v3, 0.0  ;;  %v907_v50 = vmul.f32 0.2, %v856_v3 }
  0xf6   : > { %v915_v51 = vsel %vm899_vm9, %v856_v3, %v907_v50 }
  0xf7   : > { %923 = vst [vmem:[%s1652_s26 + $0x30] sm:$0xff] %v915_v51 }
  0xf9   : > { %v857_v52 = vpop.f32.mrf.mxu2 }
  0xfa PF: > { %s14_s12 = sadd.s32 1, %s1410_s12  }
  0xfb   : > { %p11_p4 = scmp.ge.s32.totalorder %s14_s12, 4  }
  0xfd   :  { %13 = sbr.rel (!%p11_p4) target bundleno = 1 (0x1), region = 70 }

// kernel: fwd.12
= control target key start
LH: loop header
LB: loop body
LE: loop exit
PB: predicated region body
PF: predicated region fallthrough
CT: control target
= control target key end

     0   :  { %s486_s12 = smov 0   ;;  %s535_s0 = inlined_call_operand.vmem [shape: bf16[4,80], index: 0, kind: input, shape index: {}]   ;;  %s536_s1 = inlined_call_operand.vmem [shape: bf16[2,80,256], index: 1, kind: input, shape index: {}]   ;;  %s537_s2 = inlined_call_operand.vmem [shape: f32[2,4,256], index: 2, kind: output, shape index: {0}]   ;;  %s538_s3 = inlined_call_operand.vmem [shape: f32[2,4,256], index: 3, kind: output, shape index: {1}]  }
   0x1 LB: > { %s383_s13 = sadd.s32 4294967295, %s464_s12   ;;  %p387_p0 = scmp.ge.s32.totalorder %s464_s12, 1  ;;  %s464_s12 = sphi %s486_s12, %s14_s12  }
   0x2   : > { %p140_p1 = scmp.lt.s32.totalorder %s464_s12, 3 }
   0x4   : > { %p141_p2 = pnand %p387_p0, %p140_p1 }
   0x5   : > { %p169_p3 = scmp.lt.s32.totalorder (!%p141_p2), %s383_s13, 1 }
   0x6   : > { %144 = sbr.rel (%p141_p2) target bundleno = 172 (0xac), region = 28 }
   0xb   : > { %s540_s13 = smov (!%p169_p3, %s383_s13), 1  ;;  %v185_v30 = vld [vmem:[%s535_s0] sm:$0x3]  ;;  %vm246_vm0 = vcmask 654336   ;;  %vm279_vm1 = vcmask 1043456  }
   0xc   : > { %s449_s14 = smul.u32 80, %s540_s13  ;;  %s437_s20 = sshll.u32 %s540_s13, 3 }
   0xd   : > { %s178_s23 = scalar_lea.vmem %s537_s2, %s437_s20  ;;  %s183_s26 = scalar_lea.vmem %s538_s3, %s437_s20 }
   0xe   : > { %s500_s17 = scalar_lea.vmem %s536_s1, %s449_s14 }
   0xf   : > { %v427_v0 = vld [vmem:[%s500_s17 + $0x40] sm:$0xf]  ;;  %v448_v1 = vld [vmem:[%s500_s17 + $0x44] sm:$0xf0]  ;;  %v447_v2 = vld [vmem:[%s500_s17 + $0x44] sm:$0xf] }
  0x10   : > { %v428_v3 = vor.u32 %v448_v1, %v427_v0  ;;  %v429_v4 = vld [vmem:[%s500_s17 + $0x48] sm:$0xf0]  ;;  %v419_v5 = vld [vmem:[%s500_s17 + $0x30] sm:$0xf]  ;;  %v446_v6 = vld [vmem:[%s500_s17 + $0x34] sm:$0xf0] }
  0x11   : > { %v432_v7 = vor.u32 %v447_v2, %v429_v4  ;;  %v445_v8 = vld [vmem:[%s500_s17 + $0x34] sm:$0xf]  ;;  %v421_v9 = vld [vmem:[%s500_s17 + $0x38] sm:$0xf0]  ;;  %v420_v10 = vor.u32 %v446_v6, %v419_v5  ;;  %v411_v12 = vld [vmem:[%s500_s17 + $0x20] sm:$0xf] }
  0x12   : > { %253 = vmatpush.bf16.msra.mxu0 %v428_v3  ;;  %v424_v11 = vor.u32 %v445_v8, %v421_v9  ;;  %v444_v13 = vld [vmem:[%s500_s17 + $0x24] sm:$0xf0]  ;;  %v443_v14 = vld [vmem:[%s500_s17 + $0x24] sm:$0xf]  ;;  %v413_v15 = vld [vmem:[%s500_s17 + $0x28] sm:$0xf0] }
  0x13   : > { %266 = vmatpush.bf16.msra.mxu1 %v432_v7  ;;  %v412_v16 = vor.u32 %v444_v13, %v411_v12  ;;  %v416_v17 = vor.u32 %v443_v14, %v413_v15  ;;  %v403_v18 = vld [vmem:[%s500_s17 + $0x10] sm:$0xf]  ;;  %v442_v19 = vld [vmem:[%s500_s17 + $0x14] sm:$0xf0]  ;;  %v441_v20 = vld [vmem:[%s500_s17 + $0x14] sm:$0xf] }
  0x14   : > { %v405_v21 = vld [vmem:[%s500_s17 + $0x18] sm:$0xf0]  ;;  %v404_v22 = vor.u32 %v442_v19, %v403_v18  ;;  %v395_v24 = vld [vmem:[%s500_s17] sm:$0xf]  ;;  %v440_v25 = vld [vmem:[%s500_s17 + $0x4] sm:$0xf0] }
  0x15   : > { %v408_v23 = vor.u32 %v441_v20, %v405_v21  ;;  %v439_v26 = vld [vmem:[%s500_s17 + $0x4] sm:$0xf]  ;;  %v397_v27 = vld [vmem:[%s500_s17 + $0x8] sm:$0xf0]  ;;  %v396_v28 = vor.u32 %v440_v25, %v395_v24 }
  0x16   : > { %254 = vmatpush.bf16.msra.mxu0 %v420_v10  ;;  %v400_v29 = vor.u32 %v439_v26, %v397_v27 }
  0x17   : > { %267 = vmatpush.bf16.msra.mxu1 %v424_v11 }
  0x1a   : > { %255 = vmatpush.bf16.msra.mxu0 %v412_v16 }
  0x1b   : > { %268 = vmatpush.bf16.msra.mxu1 %v416_v17 }
  0x1e   : > { %256 = vmatpush.bf16.msra.mxu0 %v404_v22 }
  0x1f   : > { %269 = vmatpush.bf16.msra.mxu1 %v408_v23 }
  0x22   : > { %257 = vmatpush.bf16.msra.mxu0 %v396_v28 }
  0x23   : > { %270 = vmatpush.bf16.msra.mxu1 %v400_v29 }
  0x25   : > { %433 = vmatmul.msk.bf16.vlgmr.msra.gmra.mxu0 %vm246_vm0, %v185_v30 }
  0x26   : > { %434 = vmatmul.msk.bf16.vlgmr.msra.gmra.mxu1 %vm246_vm0, %v185_v30 }
  0xa2   : > { %v259_v31 = vpop.f32.mrf.mxu0 }
  0xa3   : > { %v272_v32 = vpop.f32.mrf.mxu1  ;;  %v285_v33 = vmul.f32 0.2, %v259_v31  ;;  %vm283_vm3 = vcmp.ge.f32.partialorder %v259_v31, 0.0 }
  0xa4   : > { %v278_v34 = vrot.slane %v272_v32, 4  ;;  %vm284_vm2 = vcmp.ge.f32.partialorder %v272_v32, 0.0  ;;  %v286_v35 = vmul.f32 0.2, %v272_v32 }
  0xa5   : > { %v287_v39 = vsel %vm283_vm3, %v259_v31, %v285_v33 }
  0xa6   : > { %v280_v36 = vsel %vm279_vm1, %v259_v31, %v278_v34  ;;  %v288_v37 = vsel %vm284_vm2, %v272_v32, %v286_v35 }
  0xa7   : > { %282 = vst [vmem:[%s178_s23] sm:$0xff] %v280_v36  ;;  %v291_v38 = vrot.slane %v288_v37, 4 }
  0xa9   : > { %v292_v40 = vsel %vm279_vm1, %v287_v39, %v291_v38 }
  0xaa   : > { %294 = vst [vmem:[%s183_s26] sm:$0xff] %v292_v40  ;;  %v261_v41 = vpop.f32.mrf.mxu0 }
  0xab   : > { %v274_v42 = vpop.f32.mrf.mxu1 }
  0xac PF: > { %s14_s12 = sadd.s32 1, %s464_s12  }
  0xad   : > { %p11_p4 = scmp.ge.s32.totalorder %s14_s12, 4  }
  0xaf   :  { %13 = sbr.rel (!%p11_p4) target bundleno = 1 (0x1), region = 70 }

// kernel: fwd.13
= control target key start
LH: loop header
LB: loop body
LE: loop exit
PB: predicated region body
PF: predicated region fallthrough
CT: control target
= control target key end

     0   :  { %s1001_s9 = smov 0   ;;  %s1161_s0 = inlined_call_operand.vmem [shape: bf16[3,112], index: 0, kind: input, shape index: {}]   ;;  %s1162_s1 = inlined_call_operand.vmem [shape: bf16[2,112,1024], index: 1, kind: input, shape index: {}]   ;;  %s1163_s2 = inlined_call_operand.vmem [shape: f32[2,3,1024], index: 2, kind: output, shape index: {}]  }
   0x1 LB: > { %s670_s10 = sadd.s32 4294967295, %s984_s9   ;;  %p674_p0 = scmp.ge.s32.totalorder %s984_s9, 1  ;;  %s984_s9 = sphi %s1001_s9, %s12_s9  }
   0x2   : > { %p112_p1 = scmp.lt.s32.totalorder %s984_s9, 3 }
   0x4   : > { %p113_p2 = pnand %p674_p0, %p112_p1 }
   0x5   : > { %p134_p3 = scmp.lt.s32.totalorder (!%p113_p2), %s670_s10, 1 }
   0x6   : > { %116 = sbr.rel (%p113_p2) target bundleno = 216 (0xd8), region = 28 }
   0xb   : > { %s1165_s10 = smov (!%p134_p3, %s670_s10), 1  ;;  %vm482_vm0 = vcmask 916480   ;;  %vm602_vm1 = vcmask 1043456  }
   0xc   : > { %s969_s11 = smul.u32 448, %s1165_s10  ;;  %s912_s17 = sshll.u32 %s1165_s10, 5 }
   0xd   : > { %s143_s20 = scalar_lea.vmem %s1163_s2, %s912_s17 }
   0xe   : > { %s1015_s14 = scalar_lea.vmem %s1162_s1, %s969_s11 }
   0xf   : > { %v872_v0 = vld [vmem:[%s1015_s14 + $0x180] sm:$0xf]  ;;  %v961_v2 = vld [vmem:[%s1015_s14 + $0x184] sm:$0xf]  ;;  %v880_v5 = vld [vmem:[%s1015_s14 + $0x188] sm:$0xf] }
  0x10   : > { %v965_v1 = vld [vmem:[%s1015_s14 + $0x19c] sm:$0xf0]  ;;  %v874_v4 = vld [vmem:[%s1015_s14 + $0x1a0] sm:$0xf0]  ;;  %v966_v6 = vld [vmem:[%s1015_s14 + $0x1a4] sm:$0xf0] }
  0x11   : > { %v873_v3 = vor.u32 %v965_v1, %v872_v0  ;;  %v877_v7 = vor.u32 %v961_v2, %v874_v4  ;;  %v881_v8 = vor.u32 %v966_v6, %v880_v5  ;;  %v962_v9 = vld [vmem:[%s1015_s14 + $0x18c] sm:$0xf]  ;;  %v840_v11 = vld [vmem:[%s1015_s14 + $0x140] sm:$0xf]  ;;  %v953_v14 = vld [vmem:[%s1015_s14 + $0x144] sm:$0xf] }
  0x12   : > { %v882_v10 = vld [vmem:[%s1015_s14 + $0x1a8] sm:$0xf0]  ;;  %v957_v13 = vld [vmem:[%s1015_s14 + $0x15c] sm:$0xf0]  ;;  %v842_v15 = vld [vmem:[%s1015_s14 + $0x160] sm:$0xf0] }
  0x13   : > { %487 = vmatpush.bf16.msra.mxu0 %v873_v3  ;;  %v885_v12 = vor.u32 %v962_v9, %v882_v10  ;;  %500 = vmatpush.bf16.msra.mxu1 %v877_v7  ;;  %v841_v16 = vor.u32 %v957_v13, %v840_v11  ;;  %v845_v17 = vor.u32 %v953_v14, %v842_v15  ;;  %v848_v18 = vld [vmem:[%s1015_s14 + $0x148] sm:$0xf]  ;;  %v954_v20 = vld [vmem:[%s1015_s14 + $0x14c] sm:$0xf]  ;;  %v808_v23 = vld [vmem:[%s1015_s14 + $0x100] sm:$0xf] }
  0x14   : > { %513 = vmatpush.bf16.msra.mxu2 %v881_v8  ;;  %v958_v19 = vld [vmem:[%s1015_s14 + $0x164] sm:$0xf0]  ;;  %v850_v22 = vld [vmem:[%s1015_s14 + $0x168] sm:$0xf0]  ;;  %v949_v24 = vld [vmem:[%s1015_s14 + $0x11c] sm:$0xf0] }
  0x15   : > { %526 = vmatpush.bf16.msra.mxu3 %v885_v12  ;;  %v849_v21 = vor.u32 %v958_v19, %v848_v18  ;;  %v853_v25 = vor.u32 %v954_v20, %v850_v22  ;;  %v945_v26 = vld [vmem:[%s1015_s14 + $0x104] sm:$0xf]  ;;  %v816_v28 = vld [vmem:[%s1015_s14 + $0x108] sm:$0xf]  ;;  %v809_v29 = vor.u32 %v949_v24, %v808_v23  ;;  %v946_v31 = vld [vmem:[%s1015_s14 + $0x10c] sm:$0xf] }
  0x16   : > { %v810_v27 = vld [vmem:[%s1015_s14 + $0x120] sm:$0xf0]  ;;  %v950_v30 = vld [vmem:[%s1015_s14 + $0x124] sm:$0xf0]  ;;  %v818_v32 = vld [vmem:[%s1015_s14 + $0x128] sm:$0xf0] }
  0x17   : > { %488 = vmatpush.bf16.msra.mxu0 %v841_v16  ;;  %501 = vmatpush.bf16.msra.mxu1 %v845_v17  ;;  %v813_v33 = vor.u32 %v945_v26, %v810_v27  ;;  %v817_v34 = vor.u32 %v950_v30, %v816_v28  ;;  %v776_v35 = vld [vmem:[%s1015_s14 + $0xc0] sm:$0xf]  ;;  %v937_v37 = vld [vmem:[%s1015_s14 + $0xc4] sm:$0xf]  ;;  %v821_v38 = vor.u32 %v946_v31, %v818_v32  ;;  %v784_v40 = vld [vmem:[%s1015_s14 + $0xc8] sm:$0xf] }
  0x18   : > { %514 = vmatpush.bf16.msra.mxu2 %v849_v21  ;;  %v941_v36 = vld [vmem:[%s1015_s14 + $0xdc] sm:$0xf0]  ;;  %v778_v39 = vld [vmem:[%s1015_s14 + $0xe0] sm:$0xf0]  ;;  %v942_v41 = vld [vmem:[%s1015_s14 + $0xe4] sm:$0xf0] }
  0x19   : > { %527 = vmatpush.bf16.msra.mxu3 %v853_v25  ;;  %v938_v42 = vld [vmem:[%s1015_s14 + $0xcc] sm:$0xf]  ;;  %v777_v44 = vor.u32 %v941_v36, %v776_v35  ;;  %v781_v45 = vor.u32 %v937_v37, %v778_v39  ;;  %v785_v46 = vor.u32 %v942_v41, %v784_v40  ;;  %v744_v47 = vld [vmem:[%s1015_s14 + $0x80] sm:$0xf]  ;;  %v929_v49 = vld [vmem:[%s1015_s14 + $0x84] sm:$0xf] }
  0x1a   : > { %v786_v43 = vld [vmem:[%s1015_s14 + $0xe8] sm:$0xf0]  ;;  %v933_v48 = vld [vmem:[%s1015_s14 + $0x9c] sm:$0xf0]  ;;  %v746_v51 = vld [vmem:[%s1015_s14 + $0xa0] sm:$0xf0] }
  0x1b   : > { %489 = vmatpush.bf16.msra.mxu0 %v809_v29  ;;  %502 = vmatpush.bf16.msra.mxu1 %v813_v33  ;;  %v789_v50 = vor.u32 %v938_v42, %v786_v43  ;;  %v752_v52 = vld [vmem:[%s1015_s14 + $0x88] sm:$0xf]  ;;  %v930_v54 = vld [vmem:[%s1015_s14 + $0x8c] sm:$0xf]  ;;  %v745_v56 = vor.u32 %v933_v48, %v744_v47  ;;  %v749_v57 = vor.u32 %v929_v49, %v746_v51  ;;  %v712_v59 = vld [vmem:[%s1015_s14 + $0x40] sm:$0xf] }
  0x1c   : > { %515 = vmatpush.bf16.msra.mxu2 %v817_v34  ;;  %v934_v53 = vld [vmem:[%s1015_s14 + $0xa4] sm:$0xf0]  ;;  %v754_v55 = vld [vmem:[%s1015_s14 + $0xa8] sm:$0xf0]  ;;  %v925_v60 = vld [vmem:[%s1015_s14 + $0x5c] sm:$0xf0] }
  0x1d   : > { %528 = vmatpush.bf16.msra.mxu3 %v821_v38  ;;  %v753_v58 = vor.u32 %v934_v53, %v752_v52  ;;  %v921_v61 = vld [vmem:[%s1015_s14 + $0x44] sm:$0xf]  ;;  %v757_v62 = vor.u32 %v930_v54, %v754_v55  ;;  %v720_v0 = vld [vmem:[%s1015_s14 + $0x48] sm:$0xf]  ;;  %v922_v2 = vld [vmem:[%s1015_s14 + $0x4c] sm:$0xf]  ;;  %v713_v4 = vor.u32 %v925_v60, %v712_v59 }
  0x1e   : > { %v714_v63 = vld [vmem:[%s1015_s14 + $0x60] sm:$0xf0]  ;;  %v926_v1 = vld [vmem:[%s1015_s14 + $0x64] sm:$0xf0]  ;;  %v722_v3 = vld [vmem:[%s1015_s14 + $0x68] sm:$0xf0] }
  0x1f   : > { %490 = vmatpush.bf16.msra.mxu0 %v777_v44  ;;  %503 = vmatpush.bf16.msra.mxu1 %v781_v45  ;;  %v680_v5 = vld [vmem:[%s1015_s14] sm:$0xf]  ;;  %v717_v7 = vor.u32 %v921_v61, %v714_v63  ;;  %v721_v8 = vor.u32 %v926_v1, %v720_v0  ;;  %v913_v9 = vld [vmem:[%s1015_s14 + $0x4] sm:$0xf]  ;;  %v688_v11 = vld [vmem:[%s1015_s14 + $0x8] sm:$0xf]  ;;  %v725_v12 = vor.u32 %v922_v2, %v722_v3 }
  0x20   : > { %516 = vmatpush.bf16.msra.mxu2 %v785_v46  ;;  %v917_v6 = vld [vmem:[%s1015_s14 + $0x1c] sm:$0xf0]  ;;  %v682_v10 = vld [vmem:[%s1015_s14 + $0x20] sm:$0xf0]  ;;  %v918_v13 = vld [vmem:[%s1015_s14 + $0x24] sm:$0xf0] }
  0x21   : > { %529 = vmatpush.bf16.msra.mxu3 %v789_v50  ;;  %v914_v14 = vld [vmem:[%s1015_s14 + $0xc] sm:$0xf]  ;;  %v888_v16 = vld [vmem:[%s1015_s14 + $0x190] sm:$0xf]  ;;  %v963_v18 = vld [vmem:[%s1015_s14 + $0x194] sm:$0xf]  ;;  %v681_v19 = vor.u32 %v917_v6, %v680_v5  ;;  %v685_v23 = vor.u32 %v913_v9, %v682_v10  ;;  %v689_v24 = vor.u32 %v918_v13, %v688_v11 }
  0x22   : > { %v690_v15 = vld [vmem:[%s1015_s14 + $0x28] sm:$0xf0]  ;;  %v967_v17 = vld [vmem:[%s1015_s14 + $0x1ac] sm:$0xf0]  ;;  %v890_v20 = vld [vmem:[%s1015_s14 + $0x1b0] sm:$0xf0] }
  0x23   : > { %491 = vmatpush.bf16.msra.mxu0 %v745_v56  ;;  %504 = vmatpush.bf16.msra.mxu1 %v749_v57  ;;  %v896_v21 = vld [vmem:[%s1015_s14 + $0x198] sm:$0xf]  ;;  %v964_v25 = vld [vmem:[%s1015_s14 + $0x19c] sm:$0xf]  ;;  %v693_v27 = vor.u32 %v914_v14, %v690_v15  ;;  %v889_v28 = vor.u32 %v967_v17, %v888_v16  ;;  %v893_v29 = vor.u32 %v963_v18, %v890_v20  ;;  %v1084_v31 = vld [vmem:[%s1161_s0] sm:$0x3] }
  0x24   : > { %517 = vmatpush.bf16.msra.mxu2 %v753_v58  ;;  %v968_v22 = vld [vmem:[%s1015_s14 + $0x1b4] sm:$0xf0]  ;;  %v898_v26 = vld [vmem:[%s1015_s14 + $0x1b8] sm:$0xf0]  ;;  %v856_v32 = vld [vmem:[%s1015_s14 + $0x150] sm:$0xf] }
  0x25   : > { %530 = vmatpush.bf16.msra.mxu3 %v757_v62  ;;  %v897_v30 = vor.u32 %v968_v22, %v896_v21  ;;  %v959_v33 = vld [vmem:[%s1015_s14 + $0x16c] sm:$0xf0]  ;;  %v955_v34 = vld [vmem:[%s1015_s14 + $0x154] sm:$0xf]  ;;  %v901_v35 = vor.u32 %v964_v25, %v898_v26  ;;  %v864_v37 = vld [vmem:[%s1015_s14 + $0x158] sm:$0xf] }
  0x26   : > { %v858_v36 = vld [vmem:[%s1015_s14 + $0x170] sm:$0xf0]  ;;  %v960_v38 = vld [vmem:[%s1015_s14 + $0x174] sm:$0xf0]  ;;  %v956_v39 = vld [vmem:[%s1015_s14 + $0x15c] sm:$0xf]  ;;  %v857_v41 = vor.u32 %v959_v33, %v856_v32 }
  0x27   : > { %492 = vmatpush.bf16.msra.mxu0 %v713_v4  ;;  %505 = vmatpush.bf16.msra.mxu1 %v717_v7  ;;  %v866_v40 = vld [vmem:[%s1015_s14 + $0x178] sm:$0xf0]  ;;  %v861_v42 = vor.u32 %v955_v34, %v858_v36  ;;  %v865_v43 = vor.u32 %v960_v38, %v864_v37  ;;  %v824_v44 = vld [vmem:[%s1015_s14 + $0x110] sm:$0xf]  ;;  %v947_v46 = vld [vmem:[%s1015_s14 + $0x114] sm:$0xf] }
  0x28   : > { %518 = vmatpush.bf16.msra.mxu2 %v721_v8  ;;  %v951_v45 = vld [vmem:[%s1015_s14 + $0x12c] sm:$0xf0]  ;;  %v869_v47 = vor.u32 %v956_v39, %v866_v40  ;;  %v826_v48 = vld [vmem:[%s1015_s14 + $0x130] sm:$0xf0]  ;;  %v832_v49 = vld [vmem:[%s1015_s14 + $0x118] sm:$0xf] }
  0x29   : > { %531 = vmatpush.bf16.msra.mxu3 %v725_v12  ;;  %v952_v50 = vld [vmem:[%s1015_s14 + $0x134] sm:$0xf0]  ;;  %v948_v51 = vld [vmem:[%s1015_s14 + $0x11c] sm:$0xf]  ;;  %v825_v53 = vor.u32 %v951_v45, %v824_v44  ;;  %v829_v54 = vor.u32 %v947_v46, %v826_v48  ;;  %v792_v56 = vld [vmem:[%s1015_s14 + $0xd0] sm:$0xf] }
  0x2a   : > { %v834_v52 = vld [vmem:[%s1015_s14 + $0x138] sm:$0xf0]  ;;  %v833_v55 = vor.u32 %v952_v50, %v832_v49  ;;  %v943_v57 = vld [vmem:[%s1015_s14 + $0xec] sm:$0xf0]  ;;  %v939_v58 = vld [vmem:[%s1015_s14 + $0xd4] sm:$0xf] }
  0x2b   : > { %493 = vmatpush.bf16.msra.mxu0 %v681_v19  ;;  %506 = vmatpush.bf16.msra.mxu1 %v685_v23  ;;  %v837_v59 = vor.u32 %v948_v51, %v834_v52  ;;  %v794_v60 = vld [vmem:[%s1015_s14 + $0xf0] sm:$0xf0]  ;;  %v800_v61 = vld [vmem:[%s1015_s14 + $0xd8] sm:$0xf]  ;;  %v940_v63 = vld [vmem:[%s1015_s14 + $0xdc] sm:$0xf]  ;;  %v793_v1 = vor.u32 %v943_v57, %v792_v56 }
  0x2c   : > { %519 = vmatpush.bf16.msra.mxu2 %v689_v24  ;;  %v944_v62 = vld [vmem:[%s1015_s14 + $0xf4] sm:$0xf0]  ;;  %v802_v0 = vld [vmem:[%s1015_s14 + $0xf8] sm:$0xf0]  ;;  %v797_v2 = vor.u32 %v939_v58, %v794_v60  ;;  %v760_v4 = vld [vmem:[%s1015_s14 + $0x90] sm:$0xf] }
  0x2d   : > { %532 = vmatpush.bf16.msra.mxu3 %v693_v27  ;;  %v801_v3 = vor.u32 %v944_v62, %v800_v61  ;;  %v935_v5 = vld [vmem:[%s1015_s14 + $0xac] sm:$0xf0]  ;;  %v931_v6 = vld [vmem:[%s1015_s14 + $0x94] sm:$0xf]  ;;  %v805_v7 = vor.u32 %v940_v63, %v802_v0  ;;  %v768_v9 = vld [vmem:[%s1015_s14 + $0x98] sm:$0xf] }
  0x2e   : > { %902 = vmatmul.msk.bf16.vlgmr.msra.gmra.mxu0 %vm482_vm0, %v1084_v31  ;;  %903 = vmatmul.msk.bf16.vlgmr.msra.gmra.mxu1 %vm482_vm0, %v1084_v31  ;;  %v762_v8 = vld [vmem:[%s1015_s14 + $0xb0] sm:$0xf0]  ;;  %v936_v10 = vld [vmem:[%s1015_s14 + $0xb4] sm:$0xf0]  ;;  %v932_v11 = vld [vmem:[%s1015_s14 + $0x9c] sm:$0xf]  ;;  %v761_v13 = vor.u32 %v935_v5, %v760_v4 }
  0x2f   : > { %539 = vmatpush.bf16.msrb.mxu0 %v889_v28  ;;  %552 = vmatpush.bf16.msrb.mxu1 %v893_v29  ;;  %v770_v12 = vld [vmem:[%s1015_s14 + $0xb8] sm:$0xf0]  ;;  %v765_v14 = vor.u32 %v931_v6, %v762_v8  ;;  %v769_v15 = vor.u32 %v936_v10, %v768_v9  ;;  %v728_v16 = vld [vmem:[%s1015_s14 + $0x50] sm:$0xf]  ;;  %v923_v18 = vld [vmem:[%s1015_s14 + $0x54] sm:$0xf] }
  0x30   : > { %565 = vmatpush.bf16.msrb.mxu2 %v897_v30  ;;  %905 = vmatmul.msk.bf16.vlgmr.msra.gmra.mxu3 %vm482_vm0, %v1084_v31  ;;  %v927_v17 = vld [vmem:[%s1015_s14 + $0x6c] sm:$0xf0]  ;;  %v773_v19 = vor.u32 %v932_v11, %v770_v12  ;;  %v730_v20 = vld [vmem:[%s1015_s14 + $0x70] sm:$0xf0]  ;;  %v736_v21 = vld [vmem:[%s1015_s14 + $0x58] sm:$0xf] }
  0x31   : > { %578 = vmatpush.bf16.msrb.mxu3 %v901_v35  ;;  %904 = vmatmul.msk.bf16.vlgmr.msra.gmra.mxu2 %vm482_vm0, %v1084_v31  ;;  %v928_v22 = vld [vmem:[%s1015_s14 + $0x74] sm:$0xf0]  ;;  %v924_v23 = vld [vmem:[%s1015_s14 + $0x5c] sm:$0xf]  ;;  %v729_v25 = vor.u32 %v927_v17, %v728_v16  ;;  %v733_v26 = vor.u32 %v923_v18, %v730_v20  ;;  %v696_v28 = vld [vmem:[%s1015_s14 + $0x10] sm:$0xf] }
  0x32   : > { %v738_v24 = vld [vmem:[%s1015_s14 + $0x78] sm:$0xf0]  ;;  %v737_v27 = vor.u32 %v928_v22, %v736_v21  ;;  %v919_v29 = vld [vmem:[%s1015_s14 + $0x2c] sm:$0xf0]  ;;  %v915_v30 = vld [vmem:[%s1015_s14 + $0x14] sm:$0xf] }
  0x33   : > { %540 = vmatpush.bf16.msrb.mxu0 %v857_v41  ;;  %553 = vmatpush.bf16.msrb.mxu1 %v861_v42  ;;  %v741_v32 = vor.u32 %v924_v23, %v738_v24  ;;  %v698_v33 = vld [vmem:[%s1015_s14 + $0x30] sm:$0xf0]  ;;  %v704_v34 = vld [vmem:[%s1015_s14 + $0x18] sm:$0xf]  ;;  %v916_v36 = vld [vmem:[%s1015_s14 + $0x1c] sm:$0xf]  ;;  %v697_v38 = vor.u32 %v919_v29, %v696_v28 }
  0x34   : > { %566 = vmatpush.bf16.msrb.mxu2 %v865_v43  ;;  %v920_v35 = vld [vmem:[%s1015_s14 + $0x34] sm:$0xf0]  ;;  %v706_v37 = vld [vmem:[%s1015_s14 + $0x38] sm:$0xf0]  ;;  %v701_v39 = vor.u32 %v915_v30, %v698_v33 }
  0x35   : > { %579 = vmatpush.bf16.msrb.mxu3 %v869_v47  ;;  %v705_v40 = vor.u32 %v920_v35, %v704_v34  ;;  %v709_v41 = vor.u32 %v916_v36, %v706_v37 }
  0x37   : > { %541 = vmatpush.bf16.msrb.mxu0 %v825_v53  ;;  %554 = vmatpush.bf16.msrb.mxu1 %v829_v54 }
  0x38   : > { %567 = vmatpush.bf16.msrb.mxu2 %v833_v55 }
  0x39   : > { %580 = vmatpush.bf16.msrb.mxu3 %v837_v59 }
  0x3b   : > { %542 = vmatpush.bf16.msrb.mxu0 %v793_v1  ;;  %555 = vmatpush.bf16.msrb.mxu1 %v797_v2 }
  0x3c   : > { %568 = vmatpush.bf16.msrb.mxu2 %v801_v3 }
  0x3d   : > { %581 = vmatpush.bf16.msrb.mxu3 %v805_v7 }
  0x3f   : > { %543 = vmatpush.bf16.msrb.mxu0 %v761_v13  ;;  %556 = vmatpush.bf16.msrb.mxu1 %v765_v14 }
  0x40   : > { %569 = vmatpush.bf16.msrb.mxu2 %v769_v15 }
  0x41   : > { %582 = vmatpush.bf16.msrb.mxu3 %v773_v19 }
  0x43   : > { %544 = vmatpush.bf16.msrb.mxu0 %v729_v25  ;;  %557 = vmatpush.bf16.msrb.mxu1 %v733_v26 }
  0x44   : > { %570 = vmatpush.bf16.msrb.mxu2 %v737_v27 }
  0x45   : > { %583 = vmatpush.bf16.msrb.mxu3 %v741_v32 }
  0x47   : > { %545 = vmatpush.bf16.msrb.mxu0 %v697_v38  ;;  %558 = vmatpush.bf16.msrb.mxu1 %v701_v39 }
  0x48   : > { %571 = vmatpush.bf16.msrb.mxu2 %v705_v40 }
  0x49   : > { %584 = vmatpush.bf16.msrb.mxu3 %v709_v41 }
  0x4a   : > { %906 = vmatmul.msk.bf16.vlgmr.msrb.gmra.mxu0 %vm482_vm0, %v1084_v31  ;;  %907 = vmatmul.msk.bf16.vlgmr.msrb.gmra.mxu1 %vm482_vm0, %v1084_v31 }
  0x4b   : > { %908 = vmatmul.msk.bf16.vlgmr.msrb.gmra.mxu2 %vm482_vm0, %v1084_v31 }
  0x4c   : > { %909 = vmatmul.msk.bf16.vlgmr.msrb.gmra.mxu3 %vm482_vm0, %v1084_v31 }
  0xab   : > { %v495_v42 = vpop.f32.mrf.mxu0  ;;  %v508_v43 = vpop.f32.mrf.mxu1 }
  0xac   : > { %v598_v44 = vrot.slane %v508_v43, 4 }
  0xae   : > { %v603_v45 = vsel %vm602_vm1, %v495_v42, %v598_v44 }
  0xaf   : > { %611 = vst [vmem:[%s143_s20] sm:$0x77] %v603_v45 }
  0xb3   : > { %v534_v47 = vpop.f32.mrf.mxu3  ;;  %v497_v49 = vpop.f32.mrf.mxu0 }
  0xb4   : > { %v521_v46 = vpop.f32.mrf.mxu2  ;;  %v599_v48 = vrot.slane %v534_v47, 4  ;;  %v510_v51 = vpop.f32.mrf.mxu1 }
  0xb6   : > { %v604_v50 = vsel %vm602_vm1, %v521_v46, %v599_v48 }
  0xb7   : > { %612 = vst [vmem:[%s143_s20 + $0x8] sm:$0x77] %v604_v50 }
  0xbb   : > { %v536_v52 = vpop.f32.mrf.mxu3 }
  0xbc   : > { %v523_v31 = vpop.f32.mrf.mxu2 }
  0xc7   : > { %v547_v53 = vpop.f32.mrf.mxu0  ;;  %v560_v54 = vpop.f32.mrf.mxu1 }
  0xc8   : > { %v600_v55 = vrot.slane %v560_v54, 4 }
  0xca   : > { %v605_v56 = vsel %vm602_vm1, %v547_v53, %v600_v55 }
  0xcb   : > { %613 = vst [vmem:[%s143_s20 + $0x10] sm:$0x77] %v605_v56 }
  0xce   : > { %v573_v57 = vpop.f32.mrf.mxu2 }
  0xcf   : > { %v586_v58 = vpop.f32.mrf.mxu3  ;;  %v549_v59 = vpop.f32.mrf.mxu0 }
  0xd0   : > { %v601_v60 = vrot.slane %v586_v58, 4  ;;  %v562_v61 = vpop.f32.mrf.mxu1 }
  0xd2   : > { %v606_v62 = vsel %vm602_vm1, %v573_v57, %v601_v60 }
  0xd3   : > { %614 = vst [vmem:[%s143_s20 + $0x18] sm:$0x77] %v606_v62 }
  0xd6   : > { %v575_v63 = vpop.f32.mrf.mxu2 }
  0xd7   : > { %v588_v0 = vpop.f32.mrf.mxu3 }
  0xd8 PF: > { %s12_s9 = sadd.s32 1, %s984_s9  }
  0xd9   : > { %p9_p4 = scmp.ge.s32.totalorder %s12_s9, 4  }
  0xdb   :  { %11 = sbr.rel (!%p9_p4) target bundleno = 1 (0x1), region = 58 }

</bundles_post_ra>
